<compile_context>
chip_gen: v6e
topology: v6e:2x2x1
jax: 0.10.0
libtpu: 0.0.40
codegen_flags: <defaults>
</compile_context>

<pallas_src>
import functools

import jax
import jax.numpy as jnp
from jax.experimental import pallas as pl
from jax.experimental.pallas import tpu as pltpu

EPS = 1e-5  # PyTorch LayerNorm default


def _round_up(x, m):
    return ((x + m - 1) // m) * m


def _layernorm(x, gamma, beta):
    # Two-pass statistics (mean, then centered variance): matches PyTorch LayerNorm numerics and
    # avoids the E[x^2] - E[x]^2 cancellation hazard.
    mean = jnp.mean(x, axis=-1, keepdims=True)
    d = x - mean
    var = jnp.mean(d * d, axis=-1, keepdims=True)
    return d * jax.lax.rsqrt(var + EPS) * gamma + beta


# ---------------------------------------------------------------------------
# Phase 1: sorted scatter_add(edges, graph[1]) + node MLP + residual.
# 1-D grid over overlapping (node-tile, edge-tile) pairs of the dst-sorted edge array.
# ---------------------------------------------------------------------------
def _node_update_kernel(
    # scalar-prefetch (SMEM): per-step schedule
    pair_nt_ref, pair_et_ref, acc_flag_ref, first_flag_ref, last_flag_ref,
    # streamed VMEM inputs
    dst_row_ref,              # (1, te) int32 — sorted destination ids of this edge tile
    nodes_ref,                # (tn, L) f32   — node tile (resident across its run of steps)
    edges_ref,                # (te, L) f32   — dst-sorted edge tile
    wn1a_ref, wn1b_ref, bn1_ref, gn1_ref, betan1_ref,
    wn2_ref, bn2_ref, gn2_ref, betan2_ref,
    # output
    nodes_out_ref,            # (tn, L) f32   — written once, at the node tile's last step
    # scratch
    msg_acc_ref,              # (tn, L) f32   — edge-message accumulator
    *, scatter_dtype,
):
    t = pl.program_id(0)
    nt = pair_nt_ref[t]
    tn = msg_acc_ref.shape[0]
    te = edges_ref.shape[0]

    @pl.when(first_flag_ref[t] == 1)
    def _():
        msg_acc_ref[...] = jnp.zeros_like(msg_acc_ref)

    @pl.when(acc_flag_ref[t] == 1)
    def _():
        # Local one-hot scatter restricted to this overlapping pair (MXU).
        # Compare the (1, te) shifted dst row against a constant iota (cheaper VPU path);
        # padded/out-of-tile destinations never match, so shared boundary tiles never
        # double-count.
        local_dst = dst_row_ref[...] - nt * tn                         # (1, te)
        row_ids = jax.lax.broadcasted_iota(jnp.int32, (tn, te), 0)     # (tn, te)
        onehot = (row_ids == local_dst).astype(scatter_dtype)          # (tn, te)
        msg_acc_ref[...] += jnp.dot(
            onehot, edges_ref[...].astype(scatter_dtype),
            preferred_element_type=jnp.float32)

    @pl.when(last_flag_ref[t] == 1)
    def _():
        nodes = nodes_ref[...]
        msg = msg_acc_ref[...]
        # node_network(cat([nodes, msg], -1)) in split-weight form.  This epilogue runs once
        # per node tile (cold path), so merging the two K=L dots buys essentially nothing.
        h = (jnp.dot(nodes, wn1a_ref[...], preferred_element_type=jnp.float32)
             + jnp.dot(msg, wn1b_ref[...], preferred_element_type=jnp.float32)
             + bn1_ref[...])
        h = jnp.maximum(_layernorm(h, gn1_ref[...], betan1_ref[...]), 0.0)   # ReLU
        h = jnp.dot(h, wn2_ref[...], preferred_element_type=jnp.float32) + bn2_ref[...]
        h = jnp.maximum(_layernorm(h, gn2_ref[...], betan2_ref[...]), 0.0)   # ReLU
        nodes_out_ref[...] = h + nodes


# ---------------------------------------------------------------------------
# Phase 2: edge MLP + residual on pre-gathered cat([nodes[src], nodes[dst], edges]).
# 1-D "parallel" grid over edge tiles; merged K = 3L matmul.
# ---------------------------------------------------------------------------
def _edge_update_kernel(
    xin_ref,                  # (te, 3L) f32 — pre-gathered, pre-concatenated input
    edges_ref,                # (te, L)  f32 — residual
    we1_ref, be1_ref, ge1_ref, betae1_ref,
    we2_ref, be2_ref, ge2_ref, betae2_ref,
    edges_out_ref,            # (te, L)  f32
):
    g = jnp.dot(xin_ref[...], we1_ref[...], preferred_element_type=jnp.float32) + be1_ref[...]
    g = jnp.maximum(_layernorm(g, ge1_ref[...], betae1_ref[...]), 0.0)        # ReLU
    g = jnp.dot(g, we2_ref[...], preferred_element_type=jnp.float32) + be2_ref[...]
    g = jnp.tanh(_layernorm(g, ge2_ref[...], betae2_ref[...]))                # Tanh
    edges_out_ref[...] = g + edges_ref[...]


# ---------------------------------------------------------------------------
# Wrapper
# ---------------------------------------------------------------------------
def interaction_gnn_cell(nodes, edges, graph, params, *, node_tile=256, edge_tile=512,
                         scatter_bf16=False):
    """nodes: (N, L) f32, edges: (E, L) f32, graph: (2, E) int — returns (new_nodes, new_edges)."""
    N, L = nodes.shape
    E = edges.shape[0]
    H = params["bn1"].shape[-1]

    # Te must be a multiple of 128 (lane dim of the (1, E) dst row), Tn a multiple of 8.
    tn = min(node_tile, _round_up(N, 8))
    te = min(edge_tile, _round_up(E, 128))
    n_pad = _round_up(N, tn)
    e_pad = _round_up(E, te)
    num_nt = n_pad // tn
    num_et = e_pad // te

    src = graph[0].astype(jnp.int32)
    dst = graph[1].astype(jnp.int32)
    nodes_f = nodes.astype(jnp.float32)
    edges_f = edges.astype(jnp.float32)

    # ---- Phase 1 preprocessing: sort edges by destination so each node tile only touches the
    #      contiguous range of edge tiles that actually contain its destinations.
    perm = jnp.argsort(dst)
    dst_s = dst[perm]
    edges_s = edges_f[perm]

    nodes_p = jnp.pad(nodes_f, ((0, n_pad - N), (0, 0)))
    edges_s_p = jnp.pad(edges_s, ((0, e_pad - E), (0, 0)))
    # Sentinel n_pad for padded slots: >= any real node id, so the one-hot never matches.
    dst_s_p = jnp.pad(dst_s, (0, e_pad - E), constant_values=n_pad)
    dst_row = dst_s_p.reshape(1, e_pad)

    # Per-node-tile edge-row ranges in the sorted array -> per-step (node-tile, edge-tile) pairs.
    boundaries = jnp.arange(num_nt + 1, dtype=jnp.int32) * tn
    row_bounds = jnp.searchsorted(dst_s_p, boundaries, side="left").astype(jnp.int32)
    row_start, row_end = row_bounds[:-1], row_bounds[1:]
    count = row_end - row_start
    first_tile = row_start // te
    last_tile = jnp.where(count > 0, (row_end - 1) // te, first_tile)
    n_steps = jnp.where(count > 0, last_tile - first_tile + 1, 1).astype(jnp.int32)
    step_off = jnp.concatenate([jnp.zeros((1,), jnp.int32),
                                jnp.cumsum(n_steps, dtype=jnp.int32)])
    total = step_off[-1]

    # Static upper bound on the number of overlapping pairs (sorted dst => ranges telescope).
    T = num_nt + num_et - 1
    t_ids = jnp.arange(T, dtype=jnp.int32)
    pair_nt = jnp.clip(jnp.searchsorted(step_off, t_ids, side="right").astype(jnp.int32) - 1,
                       0, num_nt - 1)
    local = t_ids - step_off[pair_nt]
    pair_et = jnp.clip(first_tile[pair_nt] + local, 0, num_et - 1).astype(jnp.int32)
    in_range = t_ids < total
    acc_flag = (in_range & (count[pair_nt] > 0)).astype(jnp.int32)
    first_flag = (in_range & (local == 0)).astype(jnp.int32)
    last_flag = (in_range & (local == n_steps[pair_nt] - 1)).astype(jnp.int32)

    def const_spec(shape):
        return pl.BlockSpec(shape, lambda *args: (0,) * len(shape))

    node_w_keys = ("wn1a", "wn1b", "bn1", "gn1", "betan1", "wn2", "bn2", "gn2", "betan2")

    scatter_dtype = jnp.bfloat16 if scatter_bf16 else jnp.float32
    kernel1 = functools.partial(_node_update_kernel, scatter_dtype=scatter_dtype)

    cost1 = pl.CostEstimate(
        flops=2 * T * tn * te * L + 2 * n_pad * (2 * L * H + H * L),
        transcendentals=2 * n_pad,  # two rsqrt per node row
        bytes_accessed=4 * (T * (te * L + te) + 2 * n_pad * L
                            + 2 * L * H + H * L + 4 * H + 4 * L),
    )

    grid_spec1 = pltpu.PrefetchScalarGridSpec(
        num_scalar_prefetch=5,
        grid=(T,),
        in_specs=[
            pl.BlockSpec((1, te), lambda t, nt, et, *_: (0, et[t])),   # sorted dst row
            pl.BlockSpec((tn, L), lambda t, nt, et, *_: (nt[t], 0)),   # node tile
            pl.BlockSpec((te, L), lambda t, nt, et, *_: (et[t], 0)),   # sorted edge tile
            *[const_spec(params[k].shape) for k in node_w_keys],
        ],
        out_specs=pl.BlockSpec((tn, L), lambda t, nt, et, *_: (nt[t], 0)),
        scratch_shapes=[pltpu.VMEM((tn, L), jnp.float32)],
    )

    nodes_new_p = pl.pallas_call(
        kernel1,
        out_shape=jax.ShapeDtypeStruct((n_pad, L), jnp.float32),
        grid_spec=grid_spec1,
        compiler_params=pltpu.CompilerParams(dimension_semantics=("arbitrary",)),
        cost_estimate=cost1,
    )(pair_nt, pair_et, acc_flag, first_flag, last_flag,
      dst_row, nodes_p, edges_s_p, *[params[k] for k in node_w_keys])

    nodes_new = nodes_new_p[:N]

    # ---- Phase 2: wrapper-side row gather (XLA dynamic gather, review option (a)) and a
    #      lane-contiguous (E, 3L) input slab so the kernel's first matmul has merged K = 3L.
    n_src = jnp.take(nodes_new, src, axis=0)
    n_dst = jnp.take(nodes_new, dst, axis=0)
    edge_in = jnp.concatenate([n_src, n_dst, edges_f], axis=-1)        # (E, 3L)
    edge_in_p = jnp.pad(edge_in, ((0, e_pad - E), (0, 0)))
    edges_p = jnp.pad(edges_f, ((0, e_pad - E), (0, 0)))

    we1 = jnp.concatenate([params["we1a"], params["we1b"], params["we1c"]], axis=0)  # (3L, H)
    edge_w = (we1, params["be1"], params["ge1"], params["betae1"],
              params["we2"], params["be2"], params["ge2"], params["betae2"])

    cost2 = pl.CostEstimate(
        flops=2 * e_pad * (3 * L * H + H * L),
        transcendentals=e_pad * (2 + L),  # two rsqrt + L tanh per edge row
        bytes_accessed=4 * (e_pad * (3 * L + 2 * L) + 3 * L * H + H * L + 4 * H + 4 * L),
    )

    edges_new_p = pl.pallas_call(
        _edge_update_kernel,
        out_shape=jax.ShapeDtypeStruct((e_pad, L), jnp.float32),
        grid=(num_et,),
        in_specs=[
            pl.BlockSpec((te, 3 * L), lambda e: (e, 0)),
            pl.BlockSpec((te, L), lambda e: (e, 0)),
            *[const_spec(w.shape) for w in edge_w],
        ],
        out_specs=pl.BlockSpec((te, L), lambda e: (e, 0)),
        compiler_params=pltpu.CompilerParams(dimension_semantics=("parallel",)),
        cost_estimate=cost2,
    )(edge_in_p, edges_p, *edge_w)

    return nodes_new, edges_new_p[:E]


# ---------------------------------------------------------------------------
# Parameters / reference
# ---------------------------------------------------------------------------
def init_params(key, latent, hidden):
    """Deterministic synthetic init. Weights stored (in, out); biases/LN params stored (1, dim)."""
    def linear(k, fan_in, fan_out):
        lim = 1.0 / jnp.sqrt(jnp.float32(fan_in))
        kw, kb = jax.random.split(k)
        w = jax.random.uniform(kw, (fan_in, fan_out), jnp.float32, -lim, lim)
        b = jax.random.uniform(kb, (1, fan_out), jnp.float32, -lim, lim)
        return w, b

    k1, k2, k3, k4 = jax.random.split(key, 4)
    wn1, bn1 = linear(k1, 2 * latent, hidden)
    wn2, bn2 = linear(k2, hidden, latent)
    we1, be1 = linear(k3, 3 * latent, hidden)
    we2, be2 = linear(k4, hidden, latent)

    ones = lambda d: jnp.ones((1, d), jnp.float32)
    zeros = lambda d: jnp.zeros((1, d), jnp.float32)
    return dict(
        wn1a=wn1[:latent], wn1b=wn1[latent:], bn1=bn1, gn1=ones(hidden), betan1=zeros(hidden),
        wn2=wn2, bn2=bn2, gn2=ones(latent), betan2=zeros(latent),
        we1a=we1[:latent], we1b=we1[latent:2 * latent], we1c=we1[2 * latent:], be1=be1,
        ge1=ones(hidden), betae1=zeros(hidden),
        we2=we2, be2=be2, ge2=ones(latent), betae2=zeros(latent),
    )


def reference_forward(nodes, edges, graph, params):
    """Pure-JAX reference mirroring the PyTorch forward (for validation)."""
    def ln(x, g, b):
        m = jnp.mean(x, -1, keepdims=True)
        v = jnp.mean((x - m) ** 2, -1, keepdims=True)
        return (x - m) * jax.lax.rsqrt(v + EPS) * g + b

    wn1 = jnp.concatenate([params["wn1a"], params["wn1b"]], 0)
    we1 = jnp.concatenate([params["we1a"], params["we1b"], params["we1c"]], 0)

    em = jax.ops.segment_sum(edges, graph[1], num_segments=nodes.shape[0])
    ni = jnp.concatenate([nodes, em], -1)
    h = jnp.maximum(ln(ni @ wn1 + params["bn1"], params["gn1"], params["betan1"]), 0.0)
    h = jnp.maximum(ln(h @ params["wn2"] + params["bn2"], params["gn2"], params["betan2"]), 0.0)
    new_nodes = h + nodes
    ei = jnp.concatenate([new_nodes[graph[0]], new_nodes[graph[1]], edges], -1)
    g = jnp.maximum(ln(ei @ we1 + params["be1"], params["ge1"], params["betae1"]), 0.0)
    g = jnp.tanh(ln(g @ params["we2"] + params["be2"], params["ge2"], params["betae2"]))
    return new_nodes, g + edges


if __name__ == "__main__":
    # hparams: latent=32, hidden=64, nb_node_layer=2, nb_edge_layer=2,
    #          layernorm=True, hidden_activation='ReLU'
    LATENT, HIDDEN = 32, 64
    N_NODES, N_EDGES = 96, 384

    key = jax.random.PRNGKey(0)
    k_nodes, k_edges, k_graph, k_params = jax.random.split(key, 4)
    nodes = jax.random.normal(k_nodes, (N_NODES, LATENT), jnp.float32)
    edges = jax.random.normal(k_edges, (N_EDGES, LATENT), jnp.float32)
    graph = jax.random.randint(k_graph, (2, N_EDGES), 0, N_NODES, jnp.int32)
    params = init_params(k_params, LATENT, HIDDEN)

    # Small tiles so the demo exercises the multi-tile sorted-scatter schedule and accumulator runs.
    fwd = jax.jit(functools.partial(interaction_gnn_cell, node_tile=32, edge_tile=128))
    nodes_out, edges_out = fwd(nodes, edges, graph, params)
    jax.block_until_ready((nodes_out, edges_out))

    ref_nodes, ref_edges = reference_forward(nodes, edges, graph, params)
    assert nodes_out.shape == ref_nodes.shape and edges_out.shape == ref_edges.shape
    assert jnp.allclose(nodes_out, ref_nodes, atol=5e-4, rtol=5e-4), "node output mismatch"
    assert jnp.allclose(edges_out, ref_edges, atol=5e-4, rtol=5e-4), "edge output mismatch"

    print("KERNEL_OK")
</pallas_src>

<mosaic_0001>
module attributes {stable_mosaic.version = 11 : i64} {
  func.func @_node_update_kernel(%arg0: i32, %arg1: memref<5xi32, #tpu.memory_space<smem>>, %arg2: memref<5xi32, #tpu.memory_space<smem>>, %arg3: memref<5xi32, #tpu.memory_space<smem>>, %arg4: memref<5xi32, #tpu.memory_space<smem>>, %arg5: memref<5xi32, #tpu.memory_space<smem>>, %arg6: memref<1x128xi32, #tpu.memory_space<vmem>>, %arg7: memref<32x32xf32, #tpu.memory_space<vmem>>, %arg8: memref<128x32xf32, #tpu.memory_space<vmem>>, %arg9: memref<32x64xf32, #tpu.memory_space<vmem>>, %arg10: memref<32x64xf32, #tpu.memory_space<vmem>>, %arg11: memref<1x64xf32, #tpu.memory_space<vmem>>, %arg12: memref<1x64xf32, #tpu.memory_space<vmem>>, %arg13: memref<1x64xf32, #tpu.memory_space<vmem>>, %arg14: memref<64x32xf32, #tpu.memory_space<vmem>>, %arg15: memref<1x32xf32, #tpu.memory_space<vmem>>, %arg16: memref<1x32xf32, #tpu.memory_space<vmem>>, %arg17: memref<1x32xf32, #tpu.memory_space<vmem>>, %arg18: memref<32x32xf32, #tpu.memory_space<vmem>>, %arg19: memref<32x32xf32, #tpu.memory_space<vmem>>) attributes {dimension_semantics = [#tpu.dimension_semantics<arbitrary>], iteration_bounds = array<i64: 5>, scalar_prefetch = 5 : i64, scratch_operands = 1 : i64, tpu.core_type = #tpu.core_type<tc>, window_params = [{transform_indices = @transform_0, window_bounds = array<i64: 1, 128>}, {transform_indices = @transform_1, window_bounds = array<i64: 32, 32>}, {transform_indices = @transform_2, window_bounds = array<i64: 128, 32>}, {pipeline_mode = #tpu.pipeline_mode<synchronous>, transform_indices = @transform_3, window_bounds = array<i64: 32, 64>}, {pipeline_mode = #tpu.pipeline_mode<synchronous>, transform_indices = @transform_4, window_bounds = array<i64: 32, 64>}, {pipeline_mode = #tpu.pipeline_mode<synchronous>, transform_indices = @transform_5, window_bounds = array<i64: 1, 64>}, {pipeline_mode = #tpu.pipeline_mode<synchronous>, transform_indices = @transform_6, window_bounds = array<i64: 1, 64>}, {pipeline_mode = #tpu.pipeline_mode<synchronous>, transform_indices = @transform_7, window_bounds = array<i64: 1, 64>}, {pipeline_mode = #tpu.pipeline_mode<synchronous>, transform_indices = @transform_8, window_bounds = array<i64: 64, 32>}, {pipeline_mode = #tpu.pipeline_mode<synchronous>, transform_indices = @transform_9, window_bounds = array<i64: 1, 32>}, {pipeline_mode = #tpu.pipeline_mode<synchronous>, transform_indices = @transform_10, window_bounds = array<i64: 1, 32>}, {pipeline_mode = #tpu.pipeline_mode<synchronous>, transform_indices = @transform_11, window_bounds = array<i64: 1, 32>}, {transform_indices = @transform_12, window_bounds = array<i64: 32, 32>}]} {
    %0 = arith.index_cast %arg0 : i32 to index
    %1 = memref.load %arg1[%0] : memref<5xi32, #tpu.memory_space<smem>>
    %2 = arith.index_cast %arg0 : i32 to index
    %3 = memref.load %arg4[%2] : memref<5xi32, #tpu.memory_space<smem>>
    %c1_i32 = arith.constant 1 : i32
    %4 = arith.cmpi eq, %3, %c1_i32 : i32
    %5 = arith.extui %4 : i1 to i32
    %c0_i32 = arith.constant 0 : i32
    %6 = arith.cmpi ne, %5, %c0_i32 : i32
    scf.if %6 {
      %cst = arith.constant 0.000000e+00 : f32
      %17 = vector.broadcast %cst : f32 to vector<32x32xf32>
      %c0 = arith.constant 0 : index
      %c0_4 = arith.constant 0 : index
      %18 = vector.load %arg19[%c0, %c0_4] : memref<32x32xf32, #tpu.memory_space<vmem>>, vector<32x32xf32>
      tpu.vector_store %arg19[%c0, %c0_4], %17 {strides = array<i32>} : memref<32x32xf32, #tpu.memory_space<vmem>>, vector<32x32xf32>,
    } else {
    }
    %7 = arith.index_cast %arg0 : i32 to index
    %8 = memref.load %arg3[%7] : memref<5xi32, #tpu.memory_space<smem>>
    %c1_i32_0 = arith.constant 1 : i32
    %9 = arith.cmpi eq, %8, %c1_i32_0 : i32
    %10 = arith.extui %9 : i1 to i32
    %c0_i32_1 = arith.constant 0 : i32
    %11 = arith.cmpi ne, %10, %c0_i32_1 : i32
    scf.if %11 {
      %c0 = arith.constant 0 : index
      %c0_4 = arith.constant 0 : index
      %17 = vector.load %arg6[%c0, %c0_4] : memref<1x128xi32, #tpu.memory_space<vmem>>, vector<1x128xi32>
      %c32_i32 = arith.constant 32 : i32
      %18 = arith.muli %1, %c32_i32 : i32
      %19 = vector.broadcast %18 : i32 to vector<1x128xi32>
      %20 = arith.subi %17, %19 : vector<1x128xi32>
      %21 = tpu.iota {dimensions = array<i32: 0>} : vector<32x128xi32>
      %22 = vector.broadcast %20 : vector<1x128xi32> to vector<32x128xi32>
      %23 = arith.cmpi eq, %21, %22 : vector<32x128xi32>
      %24 = arith.extui %23 : vector<32x128xi1> to vector<32x128xi32>
      %25 = arith.sitofp %24 : vector<32x128xi32> to vector<32x128xf32>
      %c0_5 = arith.constant 0 : index
      %c0_6 = arith.constant 0 : index
      %26 = vector.load %arg19[%c0_5, %c0_6] : memref<32x32xf32, #tpu.memory_space<vmem>>, vector<32x32xf32>
      %c0_7 = arith.constant 0 : index
      %c0_8 = arith.constant 0 : index
      %27 = vector.load %arg8[%c0_7, %c0_8] : memref<128x32xf32, #tpu.memory_space<vmem>>, vector<128x32xf32>
      %cst = arith.constant dense<0.000000e+00> : vector<32x32xf32>
      %28 = tpu.matmul %25, %27, %cst {dimension_numbers = #tpu.dot_dimension_numbers<[1], [0], [0], [1], [0, 0, 1, 1], [], []>} : vector<32x128xf32>, vector<128x32xf32>, vector<32x32xf32> -> vector<32x32xf32>
      %29 = arith.addf %26, %28 : vector<32x32xf32>
      %c0_9 = arith.constant 0 : index
      %c0_10 = arith.constant 0 : index
      %30 = vector.load %arg19[%c0_9, %c0_10] : memref<32x32xf32, #tpu.memory_space<vmem>>, vector<32x32xf32>
      tpu.vector_store %arg19[%c0_9, %c0_10], %29 {strides = array<i32>} : memref<32x32xf32, #tpu.memory_space<vmem>>, vector<32x32xf32>,
    } else {
    }
    %12 = arith.index_cast %arg0 : i32 to index
    %13 = memref.load %arg5[%12] : memref<5xi32, #tpu.memory_space<smem>>
    %c1_i32_2 = arith.constant 1 : i32
    %14 = arith.cmpi eq, %13, %c1_i32_2 : i32
    %15 = arith.extui %14 : i1 to i32
    %c0_i32_3 = arith.constant 0 : i32
    %16 = arith.cmpi ne, %15, %c0_i32_3 : i32
    scf.if %16 {
      %c0 = arith.constant 0 : index
      %c0_4 = arith.constant 0 : index
      %17 = vector.load %arg7[%c0, %c0_4] : memref<32x32xf32, #tpu.memory_space<vmem>>, vector<32x32xf32>
      %c0_5 = arith.constant 0 : index
      %c0_6 = arith.constant 0 : index
      %18 = vector.load %arg19[%c0_5, %c0_6] : memref<32x32xf32, #tpu.memory_space<vmem>>, vector<32x32xf32>
      %c0_7 = arith.constant 0 : index
      %c0_8 = arith.constant 0 : index
      %19 = vector.load %arg9[%c0_7, %c0_8] : memref<32x64xf32, #tpu.memory_space<vmem>>, vector<32x64xf32>
      %cst = arith.constant dense<0.000000e+00> : vector<32x64xf32>
      %20 = tpu.matmul %17, %19, %cst {dimension_numbers = #tpu.dot_dimension_numbers<[1], [0], [0], [1], [0, 0, 1, 1], [], []>} : vector<32x32xf32>, vector<32x64xf32>, vector<32x64xf32> -> vector<32x64xf32>
      %c0_9 = arith.constant 0 : index
      %c0_10 = arith.constant 0 : index
      %21 = vector.load %arg10[%c0_9, %c0_10] : memref<32x64xf32, #tpu.memory_space<vmem>>, vector<32x64xf32>
      %cst_11 = arith.constant dense<0.000000e+00> : vector<32x64xf32>
      %22 = tpu.matmul %18, %21, %cst_11 {dimension_numbers = #tpu.dot_dimension_numbers<[1], [0], [0], [1], [0, 0, 1, 1], [], []>} : vector<32x32xf32>, vector<32x64xf32>, vector<32x64xf32> -> vector<32x64xf32>
      %23 = arith.addf %20, %22 : vector<32x64xf32>
      %c0_12 = arith.constant 0 : index
      %c0_13 = arith.constant 0 : index
      %24 = vector.load %arg11[%c0_12, %c0_13] : memref<1x64xf32, #tpu.memory_space<vmem>>, vector<1x64xf32>
      %25 = vector.broadcast %24 : vector<1x64xf32> to vector<32x64xf32>
      %26 = arith.addf %23, %25 : vector<32x64xf32>
      %c0_14 = arith.constant 0 : index
      %c0_15 = arith.constant 0 : index
      %27 = vector.load %arg12[%c0_14, %c0_15] : memref<1x64xf32, #tpu.memory_space<vmem>>, vector<1x64xf32>
      %c0_16 = arith.constant 0 : index
      %c0_17 = arith.constant 0 : index
      %28 = vector.load %arg13[%c0_16, %c0_17] : memref<1x64xf32, #tpu.memory_space<vmem>>, vector<1x64xf32>
      %cst_18 = arith.constant dense<0.000000e+00> : vector<32xf32>
      %29 = vector.multi_reduction <add>, %26, %cst_18 [1] : vector<32x64xf32> to vector<32xf32>
      %30 = vector.shape_cast %29 : vector<32xf32> to vector<32x1xf32>
      %cst_19 = arith.constant 6.400000e+01 : f32
      %31 = vector.broadcast %cst_19 : f32 to vector<32x1xf32>
      %32 = arith.divf %30, %31 : vector<32x1xf32>
      %33 = vector.broadcast %32 : vector<32x1xf32> to vector<32x64xf32>
      %34 = arith.subf %26, %33 : vector<32x64xf32>
      %35 = arith.mulf %34, %34 : vector<32x64xf32>
      %cst_20 = arith.constant dense<0.000000e+00> : vector<32xf32>
      %36 = vector.multi_reduction <add>, %35, %cst_20 [1] : vector<32x64xf32> to vector<32xf32>
      %37 = vector.shape_cast %36 : vector<32xf32> to vector<32x1xf32>
      %cst_21 = arith.constant 6.400000e+01 : f32
      %38 = vector.broadcast %cst_21 : f32 to vector<32x1xf32>
      %39 = arith.divf %37, %38 : vector<32x1xf32>
      %cst_22 = arith.constant 9.99999974E-6 : f32
      %40 = vector.broadcast %cst_22 : f32 to vector<32x1xf32>
      %41 = arith.addf %39, %40 : vector<32x1xf32>
      %42 = math.rsqrt %41 : vector<32x1xf32>
      %43 = vector.broadcast %42 : vector<32x1xf32> to vector<32x64xf32>
      %44 = arith.mulf %34, %43 : vector<32x64xf32>
      %45 = vector.broadcast %27 : vector<1x64xf32> to vector<32x64xf32>
      %46 = arith.mulf %44, %45 : vector<32x64xf32>
      %47 = vector.broadcast %28 : vector<1x64xf32> to vector<32x64xf32>
      %48 = arith.addf %46, %47 : vector<32x64xf32>
      %cst_23 = arith.constant 0.000000e+00 : f32
      %49 = vector.broadcast %cst_23 : f32 to vector<32x64xf32>
      %50 = arith.maximumf %48, %49 : vector<32x64xf32>
      %c0_24 = arith.constant 0 : index
      %c0_25 = arith.constant 0 : index
      %51 = vector.load %arg14[%c0_24, %c0_25] : memref<64x32xf32, #tpu.memory_space<vmem>>, vector<64x32xf32>
      %cst_26 = arith.constant dense<0.000000e+00> : vector<32x32xf32>
      %52 = tpu.matmul %50, %51, %cst_26 {dimension_numbers = #tpu.dot_dimension_numbers<[1], [0], [0], [1], [0, 0, 1, 1], [], []>} : vector<32x64xf32>, vector<64x32xf32>, vector<32x32xf32> -> vector<32x32xf32>
      %c0_27 = arith.constant 0 : index
      %c0_28 = arith.constant 0 : index
      %53 = vector.load %arg15[%c0_27, %c0_28] : memref<1x32xf32, #tpu.memory_space<vmem>>, vector<1x32xf32>
      %54 = vector.broadcast %53 : vector<1x32xf32> to vector<32x32xf32>
      %55 = arith.addf %52, %54 : vector<32x32xf32>
      %c0_29 = arith.constant 0 : index
      %c0_30 = arith.constant 0 : index
      %56 = vector.load %arg16[%c0_29, %c0_30] : memref<1x32xf32, #tpu.memory_space<vmem>>, vector<1x32xf32>
      %c0_31 = arith.constant 0 : index
      %c0_32 = arith.constant 0 : index
      %57 = vector.load %arg17[%c0_31, %c0_32] : memref<1x32xf32, #tpu.memory_space<vmem>>, vector<1x32xf32>
      %cst_33 = arith.constant dense<0.000000e+00> : vector<32xf32>
      %58 = vector.multi_reduction <add>, %55, %cst_33 [1] : vector<32x32xf32> to vector<32xf32>
      %59 = vector.shape_cast %58 : vector<32xf32> to vector<32x1xf32>
      %cst_34 = arith.constant 3.200000e+01 : f32
      %60 = vector.broadcast %cst_34 : f32 to vector<32x1xf32>
      %61 = arith.divf %59, %60 : vector<32x1xf32>
      %62 = vector.broadcast %61 : vector<32x1xf32> to vector<32x32xf32>
      %63 = arith.subf %55, %62 : vector<32x32xf32>
      %64 = arith.mulf %63, %63 : vector<32x32xf32>
      %cst_35 = arith.constant dense<0.000000e+00> : vector<32xf32>
      %65 = vector.multi_reduction <add>, %64, %cst_35 [1] : vector<32x32xf32> to vector<32xf32>
      %66 = vector.shape_cast %65 : vector<32xf32> to vector<32x1xf32>
      %cst_36 = arith.constant 3.200000e+01 : f32
      %67 = vector.broadcast %cst_36 : f32 to vector<32x1xf32>
      %68 = arith.divf %66, %67 : vector<32x1xf32>
      %cst_37 = arith.constant 9.99999974E-6 : f32
      %69 = vector.broadcast %cst_37 : f32 to vector<32x1xf32>
      %70 = arith.addf %68, %69 : vector<32x1xf32>
      %71 = math.rsqrt %70 : vector<32x1xf32>
      %72 = vector.broadcast %71 : vector<32x1xf32> to vector<32x32xf32>
      %73 = arith.mulf %63, %72 : vector<32x32xf32>
      %74 = vector.broadcast %56 : vector<1x32xf32> to vector<32x32xf32>
      %75 = arith.mulf %73, %74 : vector<32x32xf32>
      %76 = vector.broadcast %57 : vector<1x32xf32> to vector<32x32xf32>
      %77 = arith.addf %75, %76 : vector<32x32xf32>
      %cst_38 = arith.constant 0.000000e+00 : f32
      %78 = vector.broadcast %cst_38 : f32 to vector<32x32xf32>
      %79 = arith.maximumf %77, %78 : vector<32x32xf32>
      %80 = arith.addf %79, %17 : vector<32x32xf32>
      %c0_39 = arith.constant 0 : index
      %c0_40 = arith.constant 0 : index
      %81 = vector.load %arg18[%c0_39, %c0_40] : memref<32x32xf32, #tpu.memory_space<vmem>>, vector<32x32xf32>
      tpu.vector_store %arg18[%c0_39, %c0_40], %80 {strides = array<i32>} : memref<32x32xf32, #tpu.memory_space<vmem>>, vector<32x32xf32>,
    } else {
    }
    return
  }
  func.func @transform_0(%arg0: i32, %arg1: memref<5xi32, #tpu.memory_space<smem>>, %arg2: memref<5xi32, #tpu.memory_space<smem>>, %arg3: memref<5xi32, #tpu.memory_space<smem>>, %arg4: memref<5xi32, #tpu.memory_space<smem>>, %arg5: memref<5xi32, #tpu.memory_space<smem>>) -> (i32, i32) {
    %0 = arith.index_cast %arg0 : i32 to index
    %1 = memref.load %arg2[%0] : memref<5xi32, #tpu.memory_space<smem>>
    %c0_i32 = arith.constant 0 : i32
    %c0_i32_0 = arith.constant 0 : i32
    return %c0_i32, %1 : i32, i32
  }
  func.func @transform_1(%arg0: i32, %arg1: memref<5xi32, #tpu.memory_space<smem>>, %arg2: memref<5xi32, #tpu.memory_space<smem>>, %arg3: memref<5xi32, #tpu.memory_space<smem>>, %arg4: memref<5xi32, #tpu.memory_space<smem>>, %arg5: memref<5xi32, #tpu.memory_space<smem>>) -> (i32, i32) {
    %0 = arith.index_cast %arg0 : i32 to index
    %1 = memref.load %arg1[%0] : memref<5xi32, #tpu.memory_space<smem>>
    %c0_i32 = arith.constant 0 : i32
    %c0_i32_0 = arith.constant 0 : i32
    return %1, %c0_i32 : i32, i32
  }
  func.func @transform_2(%arg0: i32, %arg1: memref<5xi32, #tpu.memory_space<smem>>, %arg2: memref<5xi32, #tpu.memory_space<smem>>, %arg3: memref<5xi32, #tpu.memory_space<smem>>, %arg4: memref<5xi32, #tpu.memory_space<smem>>, %arg5: memref<5xi32, #tpu.memory_space<smem>>) -> (i32, i32) {
    %0 = arith.index_cast %arg0 : i32 to index
    %1 = memref.load %arg2[%0] : memref<5xi32, #tpu.memory_space<smem>>
    %c0_i32 = arith.constant 0 : i32
    %c0_i32_0 = arith.constant 0 : i32
    return %1, %c0_i32 : i32, i32
  }
  func.func @transform_3(%arg0: i32, %arg1: memref<5xi32, #tpu.memory_space<smem>>, %arg2: memref<5xi32, #tpu.memory_space<smem>>, %arg3: memref<5xi32, #tpu.memory_space<smem>>, %arg4: memref<5xi32, #tpu.memory_space<smem>>, %arg5: memref<5xi32, #tpu.memory_space<smem>>) -> (i32, i32) {
    %c0_i32 = arith.constant 0 : i32
    %c0_i32_0 = arith.constant 0 : i32
    %c0_i32_1 = arith.constant 0 : i32
    return %c0_i32, %c0_i32_0 : i32, i32
  }
  func.func @transform_4(%arg0: i32, %arg1: memref<5xi32, #tpu.memory_space<smem>>, %arg2: memref<5xi32, #tpu.memory_space<smem>>, %arg3: memref<5xi32, #tpu.memory_space<smem>>, %arg4: memref<5xi32, #tpu.memory_space<smem>>, %arg5: memref<5xi32, #tpu.memory_space<smem>>) -> (i32, i32) {
    %c0_i32 = arith.constant 0 : i32
    %c0_i32_0 = arith.constant 0 : i32
    %c0_i32_1 = arith.constant 0 : i32
    return %c0_i32, %c0_i32_0 : i32, i32
  }
  func.func @transform_5(%arg0: i32, %arg1: memref<5xi32, #tpu.memory_space<smem>>, %arg2: memref<5xi32, #tpu.memory_space<smem>>, %arg3: memref<5xi32, #tpu.memory_space<smem>>, %arg4: memref<5xi32, #tpu.memory_space<smem>>, %arg5: memref<5xi32, #tpu.memory_space<smem>>) -> (i32, i32) {
    %c0_i32 = arith.constant 0 : i32
    %c0_i32_0 = arith.constant 0 : i32
    %c0_i32_1 = arith.constant 0 : i32
    return %c0_i32, %c0_i32_0 : i32, i32
  }
  func.func @transform_6(%arg0: i32, %arg1: memref<5xi32, #tpu.memory_space<smem>>, %arg2: memref<5xi32, #tpu.memory_space<smem>>, %arg3: memref<5xi32, #tpu.memory_space<smem>>, %arg4: memref<5xi32, #tpu.memory_space<smem>>, %arg5: memref<5xi32, #tpu.memory_space<smem>>) -> (i32, i32) {
    %c0_i32 = arith.constant 0 : i32
    %c0_i32_0 = arith.constant 0 : i32
    %c0_i32_1 = arith.constant 0 : i32
    return %c0_i32, %c0_i32_0 : i32, i32
  }
  func.func @transform_7(%arg0: i32, %arg1: memref<5xi32, #tpu.memory_space<smem>>, %arg2: memref<5xi32, #tpu.memory_space<smem>>, %arg3: memref<5xi32, #tpu.memory_space<smem>>, %arg4: memref<5xi32, #tpu.memory_space<smem>>, %arg5: memref<5xi32, #tpu.memory_space<smem>>) -> (i32, i32) {
    %c0_i32 = arith.constant 0 : i32
    %c0_i32_0 = arith.constant 0 : i32
    %c0_i32_1 = arith.constant 0 : i32
    return %c0_i32, %c0_i32_0 : i32, i32
  }
  func.func @transform_8(%arg0: i32, %arg1: memref<5xi32, #tpu.memory_space<smem>>, %arg2: memref<5xi32, #tpu.memory_space<smem>>, %arg3: memref<5xi32, #tpu.memory_space<smem>>, %arg4: memref<5xi32, #tpu.memory_space<smem>>, %arg5: memref<5xi32, #tpu.memory_space<smem>>) -> (i32, i32) {
    %c0_i32 = arith.constant 0 : i32
    %c0_i32_0 = arith.constant 0 : i32
    %c0_i32_1 = arith.constant 0 : i32
    return %c0_i32, %c0_i32_0 : i32, i32
  }
  func.func @transform_9(%arg0: i32, %arg1: memref<5xi32, #tpu.memory_space<smem>>, %arg2: memref<5xi32, #tpu.memory_space<smem>>, %arg3: memref<5xi32, #tpu.memory_space<smem>>, %arg4: memref<5xi32, #tpu.memory_space<smem>>, %arg5: memref<5xi32, #tpu.memory_space<smem>>) -> (i32, i32) {
    %c0_i32 = arith.constant 0 : i32
    %c0_i32_0 = arith.constant 0 : i32
    %c0_i32_1 = arith.constant 0 : i32
    return %c0_i32, %c0_i32_0 : i32, i32
  }
  func.func @transform_10(%arg0: i32, %arg1: memref<5xi32, #tpu.memory_space<smem>>, %arg2: memref<5xi32, #tpu.memory_space<smem>>, %arg3: memref<5xi32, #tpu.memory_space<smem>>, %arg4: memref<5xi32, #tpu.memory_space<smem>>, %arg5: memref<5xi32, #tpu.memory_space<smem>>) -> (i32, i32) {
    %c0_i32 = arith.constant 0 : i32
    %c0_i32_0 = arith.constant 0 : i32
    %c0_i32_1 = arith.constant 0 : i32
    return %c0_i32, %c0_i32_0 : i32, i32
  }
  func.func @transform_11(%arg0: i32, %arg1: memref<5xi32, #tpu.memory_space<smem>>, %arg2: memref<5xi32, #tpu.memory_space<smem>>, %arg3: memref<5xi32, #tpu.memory_space<smem>>, %arg4: memref<5xi32, #tpu.memory_space<smem>>, %arg5: memref<5xi32, #tpu.memory_space<smem>>) -> (i32, i32) {
    %c0_i32 = arith.constant 0 : i32
    %c0_i32_0 = arith.constant 0 : i32
    %c0_i32_1 = arith.constant 0 : i32
    return %c0_i32, %c0_i32_0 : i32, i32
  }
  func.func @transform_12(%arg0: i32, %arg1: memref<5xi32, #tpu.memory_space<smem>>, %arg2: memref<5xi32, #tpu.memory_space<smem>>, %arg3: memref<5xi32, #tpu.memory_space<smem>>, %arg4: memref<5xi32, #tpu.memory_space<smem>>, %arg5: memref<5xi32, #tpu.memory_space<smem>>) -> (i32, i32) {
    %0 = arith.index_cast %arg0 : i32 to index
    %1 = memref.load %arg1[%0] : memref<5xi32, #tpu.memory_space<smem>>
    %c0_i32 = arith.constant 0 : i32
    %c0_i32_0 = arith.constant 0 : i32
    return %1, %c0_i32 : i32, i32
  }
}

module attributes {stable_mosaic.version = 11 : i64} {
  func.func @_edge_update_kernel(%arg0: i32, %arg1: memref<128x96xf32, #tpu.memory_space<vmem>>, %arg2: memref<128x32xf32, #tpu.memory_space<vmem>>, %arg3: memref<96x64xf32, #tpu.memory_space<vmem>>, %arg4: memref<1x64xf32, #tpu.memory_space<vmem>>, %arg5: memref<1x64xf32, #tpu.memory_space<vmem>>, %arg6: memref<1x64xf32, #tpu.memory_space<vmem>>, %arg7: memref<64x32xf32, #tpu.memory_space<vmem>>, %arg8: memref<1x32xf32, #tpu.memory_space<vmem>>, %arg9: memref<1x32xf32, #tpu.memory_space<vmem>>, %arg10: memref<1x32xf32, #tpu.memory_space<vmem>>, %arg11: memref<128x32xf32, #tpu.memory_space<vmem>>) attributes {dimension_semantics = [#tpu.dimension_semantics<parallel>], iteration_bounds = array<i64: 3>, scalar_prefetch = 0 : i64, scratch_operands = 0 : i64, tpu.core_type = #tpu.core_type<tc>, window_params = [{transform_indices = @transform_0, window_bounds = array<i64: 128, 96>}, {transform_indices = @transform_1, window_bounds = array<i64: 128, 32>}, {pipeline_mode = #tpu.pipeline_mode<synchronous>, transform_indices = @transform_2, window_bounds = array<i64: 96, 64>}, {pipeline_mode = #tpu.pipeline_mode<synchronous>, transform_indices = @transform_3, window_bounds = array<i64: 1, 64>}, {pipeline_mode = #tpu.pipeline_mode<synchronous>, transform_indices = @transform_4, window_bounds = array<i64: 1, 64>}, {pipeline_mode = #tpu.pipeline_mode<synchronous>, transform_indices = @transform_5, window_bounds = array<i64: 1, 64>}, {pipeline_mode = #tpu.pipeline_mode<synchronous>, transform_indices = @transform_6, window_bounds = array<i64: 64, 32>}, {pipeline_mode = #tpu.pipeline_mode<synchronous>, transform_indices = @transform_7, window_bounds = array<i64: 1, 32>}, {pipeline_mode = #tpu.pipeline_mode<synchronous>, transform_indices = @transform_8, window_bounds = array<i64: 1, 32>}, {pipeline_mode = #tpu.pipeline_mode<synchronous>, transform_indices = @transform_9, window_bounds = array<i64: 1, 32>}, {transform_indices = @transform_10, window_bounds = array<i64: 128, 32>}]} {
    %c0 = arith.constant 0 : index
    %c0_0 = arith.constant 0 : index
    %0 = vector.load %arg1[%c0, %c0_0] : memref<128x96xf32, #tpu.memory_space<vmem>>, vector<128x96xf32>
    %c0_1 = arith.constant 0 : index
    %c0_2 = arith.constant 0 : index
    %1 = vector.load %arg3[%c0_1, %c0_2] : memref<96x64xf32, #tpu.memory_space<vmem>>, vector<96x64xf32>
    %cst = arith.constant dense<0.000000e+00> : vector<128x64xf32>
    %2 = tpu.matmul %0, %1, %cst {dimension_numbers = #tpu.dot_dimension_numbers<[1], [0], [0], [1], [0, 0, 1, 1], [], []>} : vector<128x96xf32>, vector<96x64xf32>, vector<128x64xf32> -> vector<128x64xf32>
    %c0_3 = arith.constant 0 : index
    %c0_4 = arith.constant 0 : index
    %3 = vector.load %arg4[%c0_3, %c0_4] : memref<1x64xf32, #tpu.memory_space<vmem>>, vector<1x64xf32>
    %4 = vector.broadcast %3 : vector<1x64xf32> to vector<128x64xf32>
    %5 = arith.addf %2, %4 : vector<128x64xf32>
    %c0_5 = arith.constant 0 : index
    %c0_6 = arith.constant 0 : index
    %6 = vector.load %arg5[%c0_5, %c0_6] : memref<1x64xf32, #tpu.memory_space<vmem>>, vector<1x64xf32>
    %c0_7 = arith.constant 0 : index
    %c0_8 = arith.constant 0 : index
    %7 = vector.load %arg6[%c0_7, %c0_8] : memref<1x64xf32, #tpu.memory_space<vmem>>, vector<1x64xf32>
    %cst_9 = arith.constant dense<0.000000e+00> : vector<128xf32>
    %8 = vector.multi_reduction <add>, %5, %cst_9 [1] : vector<128x64xf32> to vector<128xf32>
    %9 = vector.shape_cast %8 : vector<128xf32> to vector<128x1xf32>
    %cst_10 = arith.constant 6.400000e+01 : f32
    %10 = vector.broadcast %cst_10 : f32 to vector<128x1xf32>
    %11 = arith.divf %9, %10 : vector<128x1xf32>
    %12 = vector.broadcast %11 : vector<128x1xf32> to vector<128x64xf32>
    %13 = arith.subf %5, %12 : vector<128x64xf32>
    %14 = arith.mulf %13, %13 : vector<128x64xf32>
    %cst_11 = arith.constant dense<0.000000e+00> : vector<128xf32>
    %15 = vector.multi_reduction <add>, %14, %cst_11 [1] : vector<128x64xf32> to vector<128xf32>
    %16 = vector.shape_cast %15 : vector<128xf32> to vector<128x1xf32>
    %cst_12 = arith.constant 6.400000e+01 : f32
    %17 = vector.broadcast %cst_12 : f32 to vector<128x1xf32>
    %18 = arith.divf %16, %17 : vector<128x1xf32>
    %cst_13 = arith.constant 9.99999974E-6 : f32
    %19 = vector.broadcast %cst_13 : f32 to vector<128x1xf32>
    %20 = arith.addf %18, %19 : vector<128x1xf32>
    %21 = math.rsqrt %20 : vector<128x1xf32>
    %22 = vector.broadcast %21 : vector<128x1xf32> to vector<128x64xf32>
    %23 = arith.mulf %13, %22 : vector<128x64xf32>
    %24 = vector.broadcast %6 : vector<1x64xf32> to vector<128x64xf32>
    %25 = arith.mulf %23, %24 : vector<128x64xf32>
    %26 = vector.broadcast %7 : vector<1x64xf32> to vector<128x64xf32>
    %27 = arith.addf %25, %26 : vector<128x64xf32>
    %cst_14 = arith.constant 0.000000e+00 : f32
    %28 = vector.broadcast %cst_14 : f32 to vector<128x64xf32>
    %29 = arith.maximumf %27, %28 : vector<128x64xf32>
    %c0_15 = arith.constant 0 : index
    %c0_16 = arith.constant 0 : index
    %30 = vector.load %arg7[%c0_15, %c0_16] : memref<64x32xf32, #tpu.memory_space<vmem>>, vector<64x32xf32>
    %cst_17 = arith.constant dense<0.000000e+00> : vector<128x32xf32>
    %31 = tpu.matmul %29, %30, %cst_17 {dimension_numbers = #tpu.dot_dimension_numbers<[1], [0], [0], [1], [0, 0, 1, 1], [], []>} : vector<128x64xf32>, vector<64x32xf32>, vector<128x32xf32> -> vector<128x32xf32>
    %c0_18 = arith.constant 0 : index
    %c0_19 = arith.constant 0 : index
    %32 = vector.load %arg8[%c0_18, %c0_19] : memref<1x32xf32, #tpu.memory_space<vmem>>, vector<1x32xf32>
    %33 = vector.broadcast %32 : vector<1x32xf32> to vector<128x32xf32>
    %34 = arith.addf %31, %33 : vector<128x32xf32>
    %c0_20 = arith.constant 0 : index
    %c0_21 = arith.constant 0 : index
    %35 = vector.load %arg9[%c0_20, %c0_21] : memref<1x32xf32, #tpu.memory_space<vmem>>, vector<1x32xf32>
    %c0_22 = arith.constant 0 : index
    %c0_23 = arith.constant 0 : index
    %36 = vector.load %arg10[%c0_22, %c0_23] : memref<1x32xf32, #tpu.memory_space<vmem>>, vector<1x32xf32>
    %cst_24 = arith.constant dense<0.000000e+00> : vector<128xf32>
    %37 = vector.multi_reduction <add>, %34, %cst_24 [1] : vector<128x32xf32> to vector<128xf32>
    %38 = vector.shape_cast %37 : vector<128xf32> to vector<128x1xf32>
    %cst_25 = arith.constant 3.200000e+01 : f32
    %39 = vector.broadcast %cst_25 : f32 to vector<128x1xf32>
    %40 = arith.divf %38, %39 : vector<128x1xf32>
    %41 = vector.broadcast %40 : vector<128x1xf32> to vector<128x32xf32>
    %42 = arith.subf %34, %41 : vector<128x32xf32>
    %43 = arith.mulf %42, %42 : vector<128x32xf32>
    %cst_26 = arith.constant dense<0.000000e+00> : vector<128xf32>
    %44 = vector.multi_reduction <add>, %43, %cst_26 [1] : vector<128x32xf32> to vector<128xf32>
    %45 = vector.shape_cast %44 : vector<128xf32> to vector<128x1xf32>
    %cst_27 = arith.constant 3.200000e+01 : f32
    %46 = vector.broadcast %cst_27 : f32 to vector<128x1xf32>
    %47 = arith.divf %45, %46 : vector<128x1xf32>
    %cst_28 = arith.constant 9.99999974E-6 : f32
    %48 = vector.broadcast %cst_28 : f32 to vector<128x1xf32>
    %49 = arith.addf %47, %48 : vector<128x1xf32>
    %50 = math.rsqrt %49 : vector<128x1xf32>
    %51 = vector.broadcast %50 : vector<128x1xf32> to vector<128x32xf32>
    %52 = arith.mulf %42, %51 : vector<128x32xf32>
    %53 = vector.broadcast %35 : vector<1x32xf32> to vector<128x32xf32>
    %54 = arith.mulf %52, %53 : vector<128x32xf32>
    %55 = vector.broadcast %36 : vector<1x32xf32> to vector<128x32xf32>
    %56 = arith.addf %54, %55 : vector<128x32xf32>
    %57 = math.tanh %56 : vector<128x32xf32>
    %c0_29 = arith.constant 0 : index
    %c0_30 = arith.constant 0 : index
    %58 = vector.load %arg2[%c0_29, %c0_30] : memref<128x32xf32, #tpu.memory_space<vmem>>, vector<128x32xf32>
    %59 = arith.addf %57, %58 : vector<128x32xf32>
    %c0_31 = arith.constant 0 : index
    %c0_32 = arith.constant 0 : index
    %60 = vector.load %arg11[%c0_31, %c0_32] : memref<128x32xf32, #tpu.memory_space<vmem>>, vector<128x32xf32>
    tpu.vector_store %arg11[%c0_31, %c0_32], %59 {strides = array<i32>} : memref<128x32xf32, #tpu.memory_space<vmem>>, vector<128x32xf32>,
    return
  }
  func.func @transform_0(%arg0: i32) -> (i32, i32) {
    %c0_i32 = arith.constant 0 : i32
    %c0_i32_0 = arith.constant 0 : i32
    return %arg0, %c0_i32 : i32, i32
  }
  func.func @transform_1(%arg0: i32) -> (i32, i32) {
    %c0_i32 = arith.constant 0 : i32
    %c0_i32_0 = arith.constant 0 : i32
    return %arg0, %c0_i32 : i32, i32
  }
  func.func @transform_2(%arg0: i32) -> (i32, i32) {
    %c0_i32 = arith.constant 0 : i32
    %c0_i32_0 = arith.constant 0 : i32
    %c0_i32_1 = arith.constant 0 : i32
    return %c0_i32, %c0_i32_0 : i32, i32
  }
  func.func @transform_3(%arg0: i32) -> (i32, i32) {
    %c0_i32 = arith.constant 0 : i32
    %c0_i32_0 = arith.constant 0 : i32
    %c0_i32_1 = arith.constant 0 : i32
    return %c0_i32, %c0_i32_0 : i32, i32
  }
  func.func @transform_4(%arg0: i32) -> (i32, i32) {
    %c0_i32 = arith.constant 0 : i32
    %c0_i32_0 = arith.constant 0 : i32
    %c0_i32_1 = arith.constant 0 : i32
    return %c0_i32, %c0_i32_0 : i32, i32
  }
  func.func @transform_5(%arg0: i32) -> (i32, i32) {
    %c0_i32 = arith.constant 0 : i32
    %c0_i32_0 = arith.constant 0 : i32
    %c0_i32_1 = arith.constant 0 : i32
    return %c0_i32, %c0_i32_0 : i32, i32
  }
  func.func @transform_6(%arg0: i32) -> (i32, i32) {
    %c0_i32 = arith.constant 0 : i32
    %c0_i32_0 = arith.constant 0 : i32
    %c0_i32_1 = arith.constant 0 : i32
    return %c0_i32, %c0_i32_0 : i32, i32
  }
  func.func @transform_7(%arg0: i32) -> (i32, i32) {
    %c0_i32 = arith.constant 0 : i32
    %c0_i32_0 = arith.constant 0 : i32
    %c0_i32_1 = arith.constant 0 : i32
    return %c0_i32, %c0_i32_0 : i32, i32
  }
  func.func @transform_8(%arg0: i32) -> (i32, i32) {
    %c0_i32 = arith.constant 0 : i32
    %c0_i32_0 = arith.constant 0 : i32
    %c0_i32_1 = arith.constant 0 : i32
    return %c0_i32, %c0_i32_0 : i32, i32
  }
  func.func @transform_9(%arg0: i32) -> (i32, i32) {
    %c0_i32 = arith.constant 0 : i32
    %c0_i32_0 = arith.constant 0 : i32
    %c0_i32_1 = arith.constant 0 : i32
    return %c0_i32, %c0_i32_0 : i32, i32
  }
  func.func @transform_10(%arg0: i32) -> (i32, i32) {
    %c0_i32 = arith.constant 0 : i32
    %c0_i32_0 = arith.constant 0 : i32
    return %arg0, %c0_i32 : i32, i32
  }
}

</mosaic_0001>

<bundles_post_ra>
// kernel: custom-call
= control target key start
LH: loop header
LB: loop body
LE: loop exit
PB: predicated region body
PF: predicated region fallthrough
CT: control target
= control target key end

     0   :  { %s6_s0 = inlined_call_operand.vmem [shape: u32[4], index: 0, kind: output, shape index: {}]  }

// kernel: custom-call.2
= control target key start
LH: loop header
LB: loop body
LE: loop exit
PB: predicated region body
PF: predicated region fallthrough
CT: control target
= control target key end

     0   :  { %s6_s0 = inlined_call_operand.vmem [shape: u32[5], index: 0, kind: output, shape index: {}]  }

// kernel: interaction_gnn_cell.2
= control target key start
LH: loop header
LB: loop body
LE: loop exit
PB: predicated region body
PF: predicated region fallthrough
CT: control target
= control target key end

     0   :  { %s1879_s0 = inlined_call_operand.vmem [shape: s32[5], index: 0, kind: input, shape index: {}]   ;;  %s1880_s5 = inlined_call_operand.vmem [shape: s32[1,384], index: 5, kind: input, shape index: {}]   ;;  %s1881_s6 = inlined_call_operand.vmem [shape: f32[96,32], index: 6, kind: input, shape index: {}]   ;;  %s1882_s7 = inlined_call_operand.vmem [shape: f32[384,32], index: 7, kind: input, shape index: {}]   ;;  %s1883_s8 = inlined_call_operand.vmem [shape: f32[32,64], index: 8, kind: input, shape index: {}]   ;;  %s1884_s9 = inlined_call_operand.vmem [shape: f32[32,64], index: 9, kind: input, shape index: {}]   ;;  %s1885_s10 = inlined_call_operand.vmem [shape: f32[1,64], index: 10, kind: input, shape index: {}]   ;;  %s1886_s11 = inlined_call_operand.vmem [shape: f32[1,64], index: 11, kind: input, shape index: {}]   ;;  %s1887_s12 = inlined_call_operand.vmem [shape: f32[1,64], index: 12, kind: input, shape index: {}]   ;;  %s1888_s13 = inlined_call_operand.vmem [shape: f32[64,32], index: 13, kind: input, shape index: {}]   ;;  %s1889_s14 = inlined_call_operand.vmem [shape: f32[1,32], index: 14, kind: input, shape index: {}]   ;;  %s1890_s15 = inlined_call_operand.vmem [shape: f32[1,32], index: 15, kind: input, shape index: {}]   ;;  %s1891_s16 = inlined_call_operand.vmem [shape: f32[1,32], index: 16, kind: input, shape index: {}]   ;;  %s1892_s17 = inlined_call_operand.vmem [shape: f32[96,32], index: 17, kind: output, shape index: {}]   ;;  %s1893_s1 = inlined_call_operand.vmem [shape: s32[5], index: 1, kind: input, shape index: {}]   ;;  %s1894_s2 = inlined_call_operand.vmem [shape: s32[5], index: 2, kind: input, shape index: {}]   ;;  %s1895_s3 = inlined_call_operand.vmem [shape: s32[5], index: 3, kind: input, shape index: {}]   ;;  %s1896_s4 = inlined_call_operand.vmem [shape: s32[5], index: 4, kind: input, shape index: {}]  }
   0x1   :  { %1898 = sst [smem:[#allocation11_spill]] %s1879_s0  ;;  %s26_s29 = sshll.u32 %s1893_s1, 4  ;;  %s27_s29 = int_to_ptr.vmem [resolvable:$true] %s26_s29 }
   0x2   :  { %1899 = sst [smem:[#allocation12_spill]] %s1880_s5 }
   0x3   :  { %1900 = sst [smem:[#allocation13_spill]] %s1890_s15 }
   0x4   :  { %1901 = sst [smem:[#allocation14_spill]] %s1891_s16 }
   0x5   :  { %s1902_s26 = sld [smem:[#allocation11_spill]] }
   0xb   :  { %s22_s15 = sshll.u32 %s1902_s26, 4  ;;  %s23_s15 = int_to_ptr.vmem [resolvable:$true] %s22_s15 }
   0xc   :  { %s1489_s0 = scalar_lea.vmem %s23_s15, 16  ;;  %p1494_p1 = scmp.lt.s32.totalorder %s23_s15, %s23_s15 }
   0xd   :  { %p1490_p0 = scmp.ne.s32.totalorder %s23_s15, %s1489_s0  ;;  %p1495_p2 = scmp.lt.s32.totalorder %s1489_s0, %s1489_s0 }
   0xf   :  { %p1496_p3 = por %p1495_p2, %p1494_p1 }
  0x11   :  { %p1497_p4 = pnand %p1496_p3, %p1490_p0 }
  0x13   :  { %1500 = shalt.err (!%p1497_p4)  }
  0x14   :  { %s1559_s30 = smov [#allocation4]   ;;  %s1501_s18 = scalar_lea.vmem %s27_s29, 16 }
  0x15   :  { %25 = dma.vmem_to_smem %s23_s15, 16, %s1559_s30, [#allocation3] }
  0x16   :  { %p1502_p5 = scmp.ne.s32.totalorder %s27_s29, %s1501_s18  ;;  %p1506_p6 = scmp.lt.s32.totalorder %s27_s29, %s27_s29 }
  0x17   :  { %p1507_p7 = scmp.lt.s32.totalorder %s1501_s18, %s1501_s18 }
  0x19   :  { %p1508_p8 = por %p1507_p7, %p1506_p6 }
  0x1b   :  { %p1509_p9 = pnand %p1508_p8, %p1502_p5 }
  0x1d   :  { %1512 = shalt.err (!%p1509_p9)  }
  0x1e   :  { %s1560_s19 = smov [#allocation5]   ;;  %s30_s20 = sshll.u32 %s1894_s2, 4  ;;  %s31_s20 = int_to_ptr.vmem [resolvable:$true] %s30_s20 }
  0x1f   :  { %29 = dma.vmem_to_smem %s27_s29, 16, %s1560_s19, [#allocation3] }
  0x20   :  { %s34_s23 = sshll.u32 %s1895_s3, 4  ;;  %s1513_s24 = scalar_lea.vmem %s31_s20, 16  ;;  %s35_s23 = int_to_ptr.vmem [resolvable:$true] %s34_s23 }
  0x21   :  { %p1514_p10 = scmp.ne.s32.totalorder %s31_s20, %s1513_s24  ;;  %p1518_p11 = scmp.lt.s32.totalorder %s31_s20, %s31_s20 }
  0x22   :  { %p1519_p12 = scmp.lt.s32.totalorder %s1513_s24, %s1513_s24 }
  0x24   :  { %p1520_p13 = por %p1519_p12, %p1518_p11 }
  0x26   :  { %p1521_p0 = pnand %p1520_p13, %p1514_p10 }
  0x28   :  { %1524 = shalt.err (!%p1521_p0)  }
  0x29   :  { %s1561_s15 = smov [#allocation6]   ;;  %s1525_s25 = scalar_lea.vmem %s35_s23, 16 }
  0x2a   :  { %33 = dma.vmem_to_smem %s31_s20, 16, %s1561_s15, [#allocation3] }
  0x2b   :  { %p1526_p1 = scmp.ne.s32.totalorder %s35_s23, %s1525_s25  ;;  %p1530_p2 = scmp.lt.s32.totalorder %s35_s23, %s35_s23 }
  0x2c   :  { %p1531_p3 = scmp.lt.s32.totalorder %s1525_s25, %s1525_s25 }
  0x2e   :  { %p1532_p4 = por %p1531_p3, %p1530_p2 }
  0x30   :  { %p1533_p5 = pnand %p1532_p4, %p1526_p1 }
  0x32   :  { %1536 = shalt.err (!%p1533_p5)  }
  0x33   :  { %s1562_s2 = smov [#allocation7]   ;;  %s38_s27 = sshll.u32 %s1896_s4, 4  ;;  %s39_s27 = int_to_ptr.vmem [resolvable:$true] %s38_s27 }
  0x34   :  { %37 = dma.vmem_to_smem %s35_s23, 16, %s1562_s2, [#allocation3] }
  0x35   :  { %s1537_s28 = scalar_lea.vmem %s39_s27, 16  ;;  %p1542_p7 = scmp.lt.s32.totalorder %s39_s27, %s39_s27 }
  0x36   :  { %p1538_p6 = scmp.ne.s32.totalorder %s39_s27, %s1537_s28  ;;  %p1543_p8 = scmp.lt.s32.totalorder %s1537_s28, %s1537_s28 }
  0x38   :  { %p1544_p9 = por %p1543_p8, %p1542_p7 }
  0x3a   :  { %p1545_p10 = pnand %p1544_p9, %p1538_p6 }
  0x3c   :  { %1548 = shalt.err (!%p1545_p10)  }
  0x3d   :  { %s1563_s29 = smov [#allocation8]  }
  0x3e   :  { %41 = dma.vmem_to_smem %s39_s27, 16, %s1563_s29, [#allocation3] }
  0x3f   :  { %1553 = dma.done.wait [#allocation3], 80 }
  0x40   :  { %1554 = vsyncadd [#allocation3], 4294967216 }
  0x41   :  { %43 = sfence }
  0x42   :  { %s1671_s0 = smov 0  }
  0x43 LB: > { %1903 = sst [smem:[#allocation10_spill]] %s1557_s0  ;;  %s1677_s4 = sadd.s32 4294967295, %s1557_s0   ;;  %s1557_s0 = sphi %s1671_s0, %s49_s0  }
  0x44   : > { %p1251_p11 = scmp.ge.s32.totalorder %s1557_s0, 1  ;;  %p423_p12 = scmp.lt.s32.totalorder %s1557_s0, 6 }
  0x46   : > { %p424_p13 = pnand %p1251_p11, %p423_p12 }
  0x47   : > { %s477_s30 = sld [smem:[#allocation5 + %s1677_s4]] (!%p424_p13) }
  0x48   : > { %427 = sbr.rel (%p424_p13) target bundleno = 1398 (0x576), region = 68  ;;  %s482_s18 = sld [smem:[#allocation4 + %s1677_s4]] (!%p424_p13) }
  0x49   : > { %s490_s19 = sld [smem:[#allocation5 + %s1677_s4]] (!%p424_p13) }
  0x4a   : > { %s498_s1 = sld [smem:[#allocation4 + %s1677_s4]] (!%p424_p13) }
  0x4b   : > { %s1686_s5 = sld [smem:[#allocation4 + %s1677_s4]] (!%p424_p13) }
  0x4c   : > { %s507_s20 = sld [smem:[#allocation7 + %s1677_s4]] (!%p424_p13) }
  0x4d   : > { %p478_p0 = scmp.lt.s32.totalorder %s477_s30, 2  ;;  %s1904_s15 = sld [smem:[#allocation12_spill]] }
  0x4e   : > { %s1252_s21 = sshll.u32 %s482_s18, 2 }
  0x4f   : > { %s1910_s30 = smov (!%p478_p0, %s477_s30), 2  ;;  %p484_p1 = scmp.lt.s32.totalorder %s1252_s21, 11 }
  0x50   : > { %s1254_s22 = sshll.u32 %s490_s19, 4  ;;  %s1256_s3 = sshll.u32 %s498_s1, 2 }
  0x51   : > { %p492_p2 = scmp.lt.s32.totalorder %s1254_s22, 47  ;;  %s1912_s21 = smov (!%p484_p1, %s1252_s21), 11 }
  0x52   : > { %s1253_s2 = sshll.u32 %s1912_s21, 3  ;;  %p500_p3 = scmp.lt.s32.totalorder %s1256_s3, 11 }
  0x53   : > { %s480_s25 = scalar_lea.vmem %s1904_s15, %s1910_s30  ;;  %s1914_s22 = smov (!%p492_p2, %s1254_s22), 47 }
  0x54   : > { %s1698_s28 = scalar_lea.vmem %s1881_s6, %s1253_s2  ;;  %s1255_s29 = sshll.u32 %s1914_s22, 3 }
  0x55   : > { %s1703_s16 = scalar_lea.vmem %s1882_s7, %s1255_s29  ;;  %s1916_s3 = smov (!%p500_p3, %s1256_s3), 11 }
  0x56   : > { %s1257_s19 = sshll.u32 %s1916_s3, 3  ;;  %p1258_p4 = scmp.ne.s32.totalorder %s507_s20, 1 }
  0x57   : > { %s1708_s15 = scalar_lea.vmem %s1892_s17, %s1257_s19 }
  0x58   : > { %511 = sbr.rel (%p1258_p4) target bundleno = 96 (0x60), region = 72 }
  0x5d   : > { %vm512_vm0 = vcmask 261120   ;;  %v1564_v0 = vmov 0.0  }
  0x5e   : > { %513 = vst.msk [vmem:[#allocation2] sm:$0xff] %vm512_vm0, %v1564_v0  ;;  %514 = vst.msk [vmem:[#allocation2 + $0x8] sm:$0xff] %vm512_vm0, %v1564_v0 }
  0x5f   : > { %515 = vst.msk [vmem:[#allocation2 + $0x10] sm:$0xff] %vm512_vm0, %v1564_v0  ;;  %516 = vst.msk [vmem:[#allocation2 + $0x18] sm:$0xff] %vm512_vm0, %v1564_v0 }
  0x60 PF: > { %s517_s0 = sld [smem:[#allocation6 + %s1677_s4]] }
  0x66   : > { %p1259_p5 = scmp.ne.s32.totalorder %s517_s0, 1 }
  0x67   : > { %s1260_s1 = sshll.u32 (!%p1259_p5), %s1686_s5, 5 }
  0x68   : > { %521 = sbr.rel (%p1259_p5) target bundleno = 341 (0x155), region = 76 }
  0x6d   : > { %v566_v1 = vld [vmem:[%s1703_s16 + $0x78] sm:$0xff]  ;;  %v565_v2 = vld [vmem:[%s1703_s16 + $0x70] sm:$0xff]  ;;  %v564_v3 = vld [vmem:[%s1703_s16 + $0x68] sm:$0xff]  ;;  %v526_v10 = vlaneseq  ;;  %v524_v15 = vstv %s1260_s1  ;;  %v1565_v27 = vmov 1.0   ;;  %vm656_vm5 = vcmask 261120  }
  0x6e   : > { %1338 = vmatprep.subr.mxu0 %v566_v1  ;;  %1426 = vmatprep.subr.mxu1 %v566_v1  ;;  %v563_v4 = vld [vmem:[%s1703_s16 + $0x60] sm:$0xff]  ;;  %v562_v5 = vld [vmem:[%s1703_s16 + $0x58] sm:$0xff]  ;;  %v561_v6 = vld [vmem:[%s1703_s16 + $0x50] sm:$0xff] }
  0x6f   : > { %1339 = vmatpush3.msra.mxu0 %v566_v1  ;;  %1442 = vmatpush3.msra.mxu1 %v566_v1  ;;  %v560_v7 = vld [vmem:[%s1703_s16 + $0x48] sm:$0xff]  ;;  %v559_v8 = vld [vmem:[%s1703_s16 + $0x40] sm:$0xff]  ;;  %v558_v9 = vld [vmem:[%s1703_s16 + $0x38] sm:$0xff]  ;;  %v527_v13 = vshrl.u32 %v526_v10, 7 }
  0x70   : > { %1340 = vmatprep.subr.mxu0 %v565_v2  ;;  %1427 = vmatprep.subr.mxu1 %v565_v2  ;;  %v557_v11 = vld [vmem:[%s1703_s16 + $0x30] sm:$0xff]  ;;  %v556_v12 = vld [vmem:[%s1703_s16 + $0x28] sm:$0xff]  ;;  %v522_v14 = vld [vmem:[%s480_s25] sm:$0x1] }
  0x71   : > { %1341 = vmatpush3.msra.mxu0 %v565_v2  ;;  %1443 = vmatpush3.msra.mxu1 %v565_v2  ;;  %v555_v16 = vld [vmem:[%s1703_s16 + $0x20] sm:$0xff]  ;;  %v554_v17 = vld [vmem:[%s1703_s16 + $0x18] sm:$0xff]  ;;  %v525_v18 = vsub.s32 %v522_v14, %v524_v15  ;;  %v533_v19 = vsub.s32 0, %v527_v13  ;;  %v553_v20 = vld [vmem:[%s1703_s16 + $0x10] sm:$0xff]  ;;  %v529_v23 = vadd.s32 16, %v527_v13  ;;  %v528_v24 = vadd.s32 8, %v527_v13 }
  0x72   : > { %1342 = vmatprep.subr.mxu0 %v564_v3  ;;  %1428 = vmatprep.subr.mxu1 %v564_v3  ;;  %v552_v21 = vld [vmem:[%s1703_s16 + $0x8] sm:$0xff]  ;;  %v530_v25 = vadd.s32 24, %v527_v13  ;;  %v551_v26 = vld [vmem:[%s1703_s16] sm:$0xff]  ;;  %v550_v29 = vld [vmem:[#allocation2 + $0x18] sm:$0xff] }
  0x73   : > { %1343 = vmatpush3.msra.mxu0 %v564_v3  ;;  %1444 = vmatpush3.msra.mxu1 %v564_v3  ;;  %v534_v22 = vrot.slane %v525_v18, %v533_v19  ;;  %v548_v28 = vld [vmem:[#allocation2 + $0x8] sm:$0xff]  ;;  %v547_v32 = vld [vmem:[#allocation2] sm:$0xff]  ;;  %v549_v33 = vld [vmem:[#allocation2 + $0x10] sm:$0xff] }
  0x74   : > { %1344 = vmatprep.subr.mxu0 %v563_v4  ;;  %1429 = vmatprep.subr.mxu1 %v563_v4 }
  0x75   : > { %1345 = vmatpush3.msra.mxu0 %v563_v4  ;;  %1445 = vmatpush3.msra.mxu1 %v563_v4  ;;  %vm535_vm1 = vcmp.eq.s32.totalorder %v527_v13, %v534_v22  ;;  %vm537_vm2 = vcmp.eq.s32.totalorder %v529_v23, %v534_v22  ;;  %vm536_vm3 = vcmp.eq.s32.totalorder %v528_v24, %v534_v22 }
  0x76   : > { %1346 = vmatprep.subr.mxu0 %v562_v5  ;;  %1430 = vmatprep.subr.mxu1 %v562_v5  ;;  %vm538_vm4 = vcmp.eq.s32.totalorder %v530_v25, %v534_v22 }
  0x77   : > { %1347 = vmatpush3.msra.mxu0 %v562_v5  ;;  %1446 = vmatpush3.msra.mxu1 %v562_v5 }
  0x78   : > { %1348 = vmatprep.subr.mxu0 %v561_v6  ;;  %1431 = vmatprep.subr.mxu1 %v561_v6 }
  0x79   : > { %1349 = vmatpush3.msra.mxu0 %v561_v6  ;;  %1447 = vmatpush3.msra.mxu1 %v561_v6 }
  0x7a   : > { %1350 = vmatprep.subr.mxu0 %v560_v7  ;;  %1432 = vmatprep.subr.mxu1 %v560_v7 }
  0x7b   : > { %1351 = vmatpush3.msra.mxu0 %v560_v7  ;;  %1448 = vmatpush3.msra.mxu1 %v560_v7 }
  0x7c   : > { %1352 = vmatprep.subr.mxu0 %v559_v8  ;;  %1433 = vmatprep.subr.mxu1 %v559_v8 }
  0x7d   : > { %1353 = vmatpush3.msra.mxu0 %v559_v8  ;;  %1449 = vmatpush3.msra.mxu1 %v559_v8 }
  0x7e   : > { %1354 = vmatprep.subr.mxu0 %v558_v9  ;;  %1434 = vmatprep.subr.mxu1 %v558_v9 }
  0x7f   : > { %1355 = vmatpush3.msra.mxu0 %v558_v9  ;;  %1450 = vmatpush3.msra.mxu1 %v558_v9 }
  0x80   : > { %1356 = vmatprep.subr.mxu0 %v557_v11  ;;  %1435 = vmatprep.subr.mxu1 %v557_v11 }
  0x81   : > { %1357 = vmatpush3.msra.mxu0 %v557_v11  ;;  %1451 = vmatpush3.msra.mxu1 %v557_v11 }
  0x82   : > { %1358 = vmatprep.subr.mxu0 %v556_v12  ;;  %1436 = vmatprep.subr.mxu1 %v556_v12 }
  0x83   : > { %1359 = vmatpush3.msra.mxu0 %v556_v12  ;;  %1452 = vmatpush3.msra.mxu1 %v556_v12 }
  0x84   : > { %1360 = vmatprep.subr.mxu0 %v555_v16  ;;  %1437 = vmatprep.subr.mxu1 %v555_v16 }
  0x85   : > { %1361 = vmatpush3.msra.mxu0 %v555_v16  ;;  %1453 = vmatpush3.msra.mxu1 %v555_v16 }
  0x86   : > { %1362 = vmatprep.subr.mxu0 %v554_v17  ;;  %1438 = vmatprep.subr.mxu1 %v554_v17 }
  0x87   : > { %1363 = vmatpush3.msra.mxu0 %v554_v17  ;;  %1454 = vmatpush3.msra.mxu1 %v554_v17 }
  0x88   : > { %1364 = vmatprep.subr.mxu0 %v553_v20  ;;  %1439 = vmatprep.subr.mxu1 %v553_v20 }
  0x89   : > { %1365 = vmatpush3.msra.mxu0 %v553_v20  ;;  %1455 = vmatpush3.msra.mxu1 %v553_v20 }
  0x8a   : > { %1366 = vmatprep.subr.mxu0 %v552_v21  ;;  %1440 = vmatprep.subr.mxu1 %v552_v21 }
  0x8b   : > { %1367 = vmatpush3.msra.mxu0 %v552_v21  ;;  %1456 = vmatpush3.msra.mxu1 %v552_v21 }
  0x8c   : > { %1368 = vmatprep.subr.mxu0 %v551_v26  ;;  %1441 = vmatprep.subr.mxu1 %v551_v26 }
  0x8d   : > { %1369 = vmatpush3.msra.mxu0 %v551_v26  ;;  %1457 = vmatpush3.msra.mxu1 %v551_v26 }
  0x8e   : > { %1370 = vmatprep.mubr.msk.f32.mxu0 %vm535_vm1, %v1565_v27  ;;  %1373 = vmatprep.mubr.msk.f32.mxu1 %vm537_vm2, %v1565_v27 }
  0x8f   : > { %1371 = vmatmul.mubr.msk.f32.vlgmr.msra.gmra.mxu0 %vm536_vm3, %v1565_v27  ;;  %1374 = vmatmul.mubr.msk.f32.vlgmr.msra.gmra.mxu1 %vm538_vm4, %v1565_v27 }
 0x14f   : > { %v1372_v30 = vpop.f32.mrf.mxu0  ;;  %v1375_v31 = vpop.f32.mrf.mxu1 }
 0x150   : > { %v653_v34 = vadd.f32 %v1372_v30, %v548_v28  ;;  %v655_v35 = vadd.f32 %v1375_v31, %v550_v29 }
 0x151   : > { %v633_v36 = vpop.f32.mrf.mxu0  ;;  %v643_v37 = vpop.f32.mrf.mxu1 }
 0x152   : > { %658 = vst.msk [vmem:[#allocation2 + $0x8] sm:$0xff] %vm656_vm5, %v653_v34  ;;  %660 = vst.msk [vmem:[#allocation2 + $0x18] sm:$0xff] %vm656_vm5, %v655_v35  ;;  %v652_v38 = vadd.f32 %v633_v36, %v547_v32  ;;  %v654_v39 = vadd.f32 %v643_v37, %v549_v33 }
 0x154   : > { %657 = vst.msk [vmem:[#allocation2] sm:$0xff] %vm656_vm5, %v652_v38  ;;  %659 = vst.msk [vmem:[#allocation2 + $0x10] sm:$0xff] %vm656_vm5, %v654_v39 }
 0x155 PF: > { %s661_s16 = sld [smem:[#allocation8 + %s1677_s4]] }
 0x15b   : > { %p1269_p6 = scmp.ne.s32.totalorder %s661_s16, 1 }
 0x15c   : > { %s1906_s25 = sld [smem:[#allocation13_spill]] (!%p1269_p6) }
 0x15d   : > { %665 = sbr.rel (%p1269_p6) target bundleno = 1398 (0x576), region = 80  ;;  %s1907_s26 = sld [smem:[#allocation14_spill]] (!%p1269_p6) }
 0x162   : > { %v681_v40 = vld [vmem:[%s1884_s9 + $0x18] sm:$0xff]  ;;  %v680_v41 = vld [vmem:[%s1884_s9 + $0x10] sm:$0xff]  ;;  %vm682_vm6 = vcmask 261120   ;;  %v670_v42 = vld [vmem:[#allocation2] sm:$0xff]  ;;  %vm890_vm7 = vcmask 523264  }
 0x163   : > { %1376 = vmatprep.subr.mxu1 %v681_v40  ;;  %v679_v43 = vld [vmem:[%s1884_s9 + $0x8] sm:$0xff]  ;;  %1384 = vmatprep.mubr.msk.f32.mxu1 %vm682_vm6, %v670_v42  ;;  %v678_v44 = vld [vmem:[%s1884_s9] sm:$0xff]  ;;  %v677_v46 = vld [vmem:[%s1883_s8 + $0x18] sm:$0xff] }
 0x164   : > { %1377 = vmatpush3.msra.mxu1 %v681_v40  ;;  %v671_v45 = vld [vmem:[#allocation2 + $0x8] sm:$0xff]  ;;  %v672_v47 = vld [vmem:[#allocation2 + $0x10] sm:$0xff]  ;;  %v673_v49 = vld [vmem:[#allocation2 + $0x18] sm:$0xff] }
 0x165   : > { %1378 = vmatprep.subr.mxu1 %v680_v41  ;;  %v676_v48 = vld [vmem:[%s1883_s8 + $0x10] sm:$0xff]  ;;  %v675_v50 = vld [vmem:[%s1883_s8 + $0x8] sm:$0xff]  ;;  %v1759_v51 = vld [vmem:[%s1698_s28] sm:$0xff] }
 0x166   : > { %1379 = vmatpush3.msra.mxu1 %v680_v41  ;;  %v674_v52 = vld [vmem:[%s1883_s8] sm:$0xff]  ;;  %v1768_v53 = vld [vmem:[%s1698_s28 + $0x8] sm:$0xff]  ;;  %v1771_v54 = vld [vmem:[%s1698_s28 + $0x10] sm:$0xff] }
 0x167   : > { %1380 = vmatprep.subr.mxu1 %v679_v43  ;;  %v1778_v55 = vld [vmem:[%s1698_s28 + $0x18] sm:$0xff]  ;;  %v1278_v1 = vld [vmem:[%s1885_s10] ss:$0 sm:$0xff]  ;;  %v974_v34 = vld [vmem:[%s1888_s13 + $0x30] sm:$0xff] }
 0x168   : > { %1381 = vmatpush3.msra.mxu1 %v679_v43  ;;  %v975_v33 = vld [vmem:[%s1888_s13 + $0x38] sm:$0xff]  ;;  %v973_v35 = vld [vmem:[%s1888_s13 + $0x28] sm:$0xff]  ;;  %v972_v36 = vld [vmem:[%s1888_s13 + $0x20] sm:$0xff] }
 0x169   : > { %1382 = vmatprep.subr.mxu1 %v678_v44  ;;  %1404 = vmatprep.subr.mxu0 %v975_v33  ;;  %v971_v37 = vld [vmem:[%s1888_s13 + $0x18] sm:$0xff]  ;;  %v970_v38 = vld [vmem:[%s1888_s13 + $0x10] sm:$0xff]  ;;  %v969_v39 = vld [vmem:[%s1888_s13 + $0x8] sm:$0xff] }
 0x16a   : > { %1383 = vmatpush3.msra.mxu1 %v678_v44  ;;  %1405 = vmatpush3.msra.mxu0 %v975_v33  ;;  %v968_v40 = vld [vmem:[%s1888_s13] sm:$0xff] }
 0x16b   : > { %1385 = vmatmul.mubr.msk.f32.vlgmr.msra.gmra.mxu1 %vm682_vm6, %v671_v45  ;;  %1390 = vmatprep.subr.mxu1 %v677_v46 }
 0x16c   : > { %1391 = vmatpush3.msra.mxu1 %v677_v46  ;;  %1387 = vmatprep.mubr.msk.f32.mxu1 %vm682_vm6, %v672_v47 }
 0x16d   : > { %1392 = vmatprep.subr.mxu1 %v676_v48  ;;  %1406 = vmatprep.subr.mxu0 %v974_v34 }
 0x16e   : > { %1393 = vmatpush3.msra.mxu1 %v676_v48  ;;  %1407 = vmatpush3.msra.mxu0 %v974_v34 }
 0x16f   : > { %1388 = vmatmul.mubr.msk.f32.gmra.mxu1 %vm682_vm6, %v673_v49  ;;  %1394 = vmatprep.subr.mxu1 %v675_v50 }
 0x170   : > { %1395 = vmatpush3.msra.mxu1 %v675_v50  ;;  %1398 = vmatprep.mubr.msk.f32.mxu1 %vm682_vm6, %v1759_v51 }
 0x171   : > { %1396 = vmatprep.subr.mxu1 %v674_v52  ;;  %1408 = vmatprep.subr.mxu0 %v973_v35 }
 0x172   : > { %1397 = vmatpush3.msra.mxu1 %v674_v52  ;;  %1409 = vmatpush3.msra.mxu0 %v973_v35 }
 0x173   : > { %1399 = vmatmul.mubr.msk.f32.vlgmr.msra.gmra.mxu1 %vm682_vm6, %v1768_v53  ;;  %1410 = vmatprep.subr.mxu0 %v972_v36 }
 0x174   : > { %1401 = vmatprep.mubr.msk.f32.mxu1 %vm682_vm6, %v1771_v54  ;;  %1411 = vmatpush3.msra.mxu0 %v972_v36 }
 0x175   : > { %1412 = vmatprep.subr.mxu0 %v971_v37 }
 0x176   : > { %1413 = vmatpush3.msra.mxu0 %v971_v37 }
 0x177   : > { %1402 = vmatmul.mubr.msk.f32.gmra.mxu1 %vm682_vm6, %v1778_v55  ;;  %1414 = vmatprep.subr.mxu0 %v970_v38 }
 0x178   : > { %1415 = vmatpush3.msra.mxu0 %v970_v38 }
 0x179   : > { %1416 = vmatprep.subr.mxu0 %v969_v39 }
 0x17a   : > { %1417 = vmatpush3.msra.mxu0 %v969_v39 }
 0x17b   : > { %1418 = vmatprep.subr.mxu0 %v968_v40 }
 0x17c   : > { %1419 = vmatpush3.msra.mxu0 %v968_v40 }
 0x22b   : > { %v1386_v56 = vpop.f32.mrf.mxu1 }
 0x22d   : > { %v761_v57 = vpop.f32.mrf.mxu1 }
 0x22f   : > { %v1389_v58 = vpop.f32.mrf.mxu1 }
 0x231   : > { %v771_v59 = vpop.f32.mrf.mxu1 }
 0x233   : > { %v1400_v60 = vpop.f32.mrf.mxu1 }
 0x234   : > { %v864_v62 = vadd.f32 %v1400_v60, %v1386_v56  ;;  %v1280_v60 = vld [vmem:[%s1887_s12] ss:$0 sm:$0xff] }
 0x235   : > { %v858_v61 = vpop.f32.mrf.mxu1 }
 0x236   : > { %v859_v63 = vadd.f32 %v858_v61, %v761_v57  ;;  %v885_v7 = vadd.f32 %v1278_v1, %v864_v62 }
 0x237   : > { %v1403_v0 = vpop.f32.mrf.mxu1 }
 0x238   : > { %v884_v2 = vadd.f32 %v1278_v1, %v859_v63  ;;  %v874_v4 = vadd.f32 %v1403_v0, %v1389_v58  ;;  %v894_v10 = vsel %vm890_vm7, %v885_v7, 0.0  ;;  %v1279_v58 = vld [vmem:[%s1886_s11] ss:$0 sm:$0xff] }
 0x239   : > { %v868_v3 = vpop.f32.mrf.mxu1 }
 0x23a   : > { %v869_v5 = vadd.f32 %v868_v3, %v771_v59  ;;  %v891_v6 = vsel %vm890_vm7, %v884_v2, 0.0  ;;  %v887_v11 = vadd.f32 %v1278_v1, %v874_v4 }
 0x23b   : > { %892 = vadd.xlane.f32.xlu0 %v891_v6 }
 0x23c   : > { %v886_v8 = vadd.f32 %v1278_v1, %v869_v5  ;;  %v900_v12 = vsel %vm890_vm7, %v887_v11, 0.0 }
 0x23e   : > { %v897_v9 = vsel %vm890_vm7, %v886_v8, 0.0 }
 0x23f   : > { %898 = vadd.xlane.f32.xlu1 %v897_v9  ;;  %895 = vadd.xlane.f32.xlu0 %v894_v10 }
 0x243   : > { %901 = vadd.xlane.f32.xlu1 %v900_v12 }
 0x2c4   : > { %v893_v13 = vpop.xlane.xlu0 %892 }
 0x2c5   : > { %v904_v14 = vmul.f32 0.015625, %v893_v13 }
 0x2c7   : > { %v1789_v15 = vsub.f32 %v884_v2, %v904_v14 }
 0x2c8   : > { %v899_v16 = vpop.xlane.xlu1 %898  ;;  %v896_v17 = vpop.xlane.xlu0 %895 }
 0x2c9   : > { %v906_v18 = vmul.f32 0.015625, %v899_v16  ;;  %v905_v19 = vmul.f32 0.015625, %v896_v17  ;;  %v912_v20 = vmul.f32 %v1789_v15, %v1789_v15 }
 0x2cb   : > { %v1793_v21 = vsub.f32 %v886_v8, %v906_v18  ;;  %v1795_v22 = vsub.f32 %v885_v7, %v905_v19  ;;  %v916_v23 = vsel %vm890_vm7, %v912_v20, 0.0 }
 0x2cc   : > { %v902_v24 = vpop.xlane.xlu1 %901  ;;  %917 = vadd.xlane.f32.xlu0 %v916_v23 }
 0x2cd   : > { %v907_v25 = vmul.f32 0.015625, %v902_v24  ;;  %v914_v26 = vmul.f32 %v1793_v21, %v1793_v21  ;;  %v913_v27 = vmul.f32 %v1795_v22, %v1795_v22 }
 0x2cf   : > { %v1802_v28 = vsub.f32 %v887_v11, %v907_v25  ;;  %v922_v29 = vsel %vm890_vm7, %v914_v26, 0.0  ;;  %v919_v30 = vsel %vm890_vm7, %v913_v27, 0.0 }
 0x2d0   : > { %923 = vadd.xlane.f32.xlu0 %v922_v29  ;;  %920 = vadd.xlane.f32.xlu1 %v919_v30 }
 0x2d1   : > { %v915_v31 = vmul.f32 %v1802_v28, %v1802_v28 }
 0x2d3   : > { %v925_v32 = vsel %vm890_vm7, %v915_v31, 0.0 }
 0x2d4   : > { %926 = vadd.xlane.f32.xlu1 %v925_v32 }
 0x355   : > { %v918_v41 = vpop.xlane.xlu0 %917 }
 0x356   : > { %v928_v42 = vmul.f32 0.015625, %v918_v41 }
 0x358   : > { %v932_v43 = vadd.f32 1e-05, %v928_v42 }
 0x359   : > { %v921_v44 = vpop.xlane.xlu1 %920  ;;  %v924_v45 = vpop.xlane.xlu0 %923 }
 0x35a   : > { %1473 = vrsqrt.f32 %v932_v43  ;;  %v929_v46 = vmul.f32 0.015625, %v921_v44  ;;  %v930_v47 = vmul.f32 0.015625, %v924_v45 }
 0x35c   : > { %v933_v48 = vadd.f32 1e-05, %v929_v46  ;;  %v934_v49 = vadd.f32 1e-05, %v930_v47 }
 0x35d   : > { %v927_v50 = vpop.xlane.xlu1 %926 }
 0x35e   : > { %1475 = vrsqrt.f32 %v933_v48  ;;  %v931_v52 = vmul.f32 0.015625, %v927_v50 }
 0x35f   : > { %1477 = vrsqrt.f32 %v934_v49 }
 0x360   : > { %v935_v56 = vadd.f32 1e-05, %v931_v52 }
 0x362   : > { %1479 = vrsqrt.f32 %v935_v56 }
 0x367   : > { %v1474_v57 = vpop.eup %1473 }
 0x368   : > { %v940_v59 = vmul.f32 %v1474_v57, %v1789_v15  ;;  %v1281_v15 = vld [vmem:[%s1889_s14] ss:$0 sm:$0xff] }
 0x36a   : > { %v950_v61 = vmul.f32 %v1279_v58, %v940_v59 }
 0x36b   : > { %v1476_v62 = vpop.eup %1475 }
 0x36c   : > { %v1478_v63 = vpop.eup %1477  ;;  %v960_v0 = vadd.f32 %v1280_v60, %v950_v61  ;;  %v941_v1 = vmul.f32 %v1476_v62, %v1795_v22 }
 0x36d   : > { %v942_v2 = vmul.f32 %v1478_v63, %v1793_v21 }
 0x36e   : > { %v964_v3 = vmax.f32 %v960_v0, 0.0  ;;  %v951_v4 = vmul.f32 %v1279_v58, %v941_v1  ;;  %v1286_v1 = vld [vmem:[%s1906_s25] ss:$0 sm:$0xff] }
 0x36f   : > { %v1480_v5 = vpop.eup %1479  ;;  %v952_v6 = vmul.f32 %v1279_v58, %v942_v2 }
 0x370   : > { %1420 = vmatprep.mubr.msk.f32.mxu0 %vm890_vm7, %v964_v3  ;;  %v961_v7 = vadd.f32 %v1280_v60, %v951_v4  ;;  %v943_v8 = vmul.f32 %v1480_v5, %v1802_v28  ;;  %v1287_v4 = vld [vmem:[%s1907_s26] ss:$0 sm:$0xff] }
 0x371   : > { %v962_v9 = vadd.f32 %v1280_v60, %v952_v6 }
 0x372   : > { %v965_v10 = vmax.f32 %v961_v7, 0.0  ;;  %v953_v11 = vmul.f32 %v1279_v58, %v943_v8 }
 0x373   : > { %v966_v12 = vmax.f32 %v962_v9, 0.0 }
 0x374   : > { %1421 = vmatmul.mubr.msk.f32.vlgmr.msra.gmra.mxu0 %vm890_vm7, %v965_v10  ;;  %v963_v13 = vadd.f32 %v1280_v60, %v953_v11 }
 0x375   : > { %1423 = vmatprep.mubr.msk.f32.mxu0 %vm890_vm7, %v966_v12 }
 0x376   : > { %v967_v14 = vmax.f32 %v963_v13, 0.0 }
 0x378   : > { %1424 = vmatmul.mubr.msk.f32.gmra.mxu0 %vm890_vm7, %v967_v14 }
 0x434   : > { %v1422_v16 = vpop.f32.mrf.mxu0 }
 0x435   : > { %v1067_v17 = vadd.f32 %v1422_v16, %v1281_v15 }
 0x436   : > { %v1061_v18 = vpop.f32.mrf.mxu0 }
 0x437   : > { %v1062_v19 = vadd.f32 %v1281_v15, %v1061_v18  ;;  %v1085_v20 = vsel %vm682_vm6, %v1067_v17, 0.0 }
 0x438   : > { %1086 = vadd.xlane.f32.xlu1 %v1085_v20  ;;  %v1425_v21 = vpop.f32.mrf.mxu0 }
 0x439   : > { %v1077_v22 = vadd.f32 %v1425_v21, %v1281_v15  ;;  %v1082_v23 = vsel %vm682_vm6, %v1062_v19, 0.0 }
 0x43a   : > { %1083 = vadd.xlane.f32.xlu0 %v1082_v23  ;;  %v1071_v24 = vpop.f32.mrf.mxu0 }
 0x43b   : > { %v1072_v25 = vadd.f32 %v1281_v15, %v1071_v24  ;;  %v1091_v26 = vsel %vm682_vm6, %v1077_v22, 0.0 }
 0x43c   : > { %1092 = vadd.xlane.f32.xlu1 %v1091_v26 }
 0x43d   : > { %v1088_v27 = vsel %vm682_vm6, %v1072_v25, 0.0 }
 0x43e   : > { %1089 = vadd.xlane.f32.xlu0 %v1088_v27 }
 0x4c1   : > { %v1087_v28 = vpop.xlane.xlu1 %1086 }
 0x4c2   : > { %v1096_v29 = vmul.f32 0.03125, %v1087_v28 }
 0x4c3   : > { %v1084_v30 = vpop.xlane.xlu0 %1083 }
 0x4c4   : > { %v1100_v31 = vsub.f32 %v1067_v17, %v1096_v29  ;;  %v1095_v32 = vmul.f32 0.03125, %v1084_v30 }
 0x4c5   : > { %v1093_v33 = vpop.xlane.xlu1 %1092 }
 0x4c6   : > { %v1099_v34 = vsub.f32 %v1062_v19, %v1095_v32  ;;  %v1098_v35 = vmul.f32 0.03125, %v1093_v33  ;;  %v1104_v36 = vmul.f32 %v1100_v31, %v1100_v31 }
 0x4c7   : > { %v1090_v37 = vpop.xlane.xlu0 %1089 }
 0x4c8   : > { %v1102_v38 = vsub.f32 %v1077_v22, %v1098_v35  ;;  %v1097_v39 = vmul.f32 0.03125, %v1090_v37  ;;  %v1110_v40 = vsel %vm682_vm6, %v1104_v36, 0.0  ;;  %v1103_v41 = vmul.f32 %v1099_v34, %v1099_v34 }
 0x4c9   : > { %1111 = vadd.xlane.f32.xlu1 %v1110_v40 }
 0x4ca   : > { %v1101_v42 = vsub.f32 %v1072_v25, %v1097_v39  ;;  %v1107_v43 = vsel %vm682_vm6, %v1103_v41, 0.0  ;;  %v1106_v44 = vmul.f32 %v1102_v38, %v1102_v38 }
 0x4cb   : > { %1108 = vadd.xlane.f32.xlu0 %v1107_v43 }
 0x4cc   : > { %v1116_v45 = vsel %vm682_vm6, %v1106_v44, 0.0  ;;  %v1105_v46 = vmul.f32 %v1101_v42, %v1101_v42 }
 0x4cd   : > { %1117 = vadd.xlane.f32.xlu1 %v1116_v45 }
 0x4ce   : > { %v1113_v47 = vsel %vm682_vm6, %v1105_v46, 0.0 }
 0x4cf   : > { %1114 = vadd.xlane.f32.xlu0 %v1113_v47 }
 0x552   : > { %v1112_v48 = vpop.xlane.xlu1 %1111 }
 0x553   : > { %v1120_v49 = vmul.f32 0.03125, %v1112_v48 }
 0x554   : > { %v1109_v50 = vpop.xlane.xlu0 %1108 }
 0x555   : > { %v1124_v52 = vadd.f32 1e-05, %v1120_v49  ;;  %v1119_v56 = vmul.f32 0.03125, %v1109_v50 }
 0x556   : > { %v1118_v57 = vpop.xlane.xlu1 %1117 }
 0x557   : > { %1481 = vrsqrt.f32 %v1124_v52  ;;  %v1123_v58 = vadd.f32 1e-05, %v1119_v56  ;;  %v1122_v59 = vmul.f32 0.03125, %v1118_v57 }
 0x558   : > { %v1115_v60 = vpop.xlane.xlu0 %1114 }
 0x559   : > { %1483 = vrsqrt.f32 %v1123_v58  ;;  %v1126_v61 = vadd.f32 1e-05, %v1122_v59  ;;  %v1121_v62 = vmul.f32 0.03125, %v1115_v60 }
 0x55b   : > { %1485 = vrsqrt.f32 %v1126_v61  ;;  %v1125_v63 = vadd.f32 1e-05, %v1121_v62 }
 0x55d   : > { %1487 = vrsqrt.f32 %v1125_v63 }
 0x564   : > { %v1482_v0 = vpop.eup %1481 }
 0x565   : > { %v1132_v2 = vmul.f32 %v1482_v0, %v1100_v31 }
 0x566   : > { %v1484_v3 = vpop.eup %1483 }
 0x567   : > { %v1142_v5 = vmul.f32 %v1286_v1, %v1132_v2  ;;  %v1131_v6 = vmul.f32 %v1484_v3, %v1099_v34 }
 0x568   : > { %v1486_v7 = vpop.eup %1485 }
 0x569   : > { %v1152_v8 = vadd.f32 %v1287_v4, %v1142_v5  ;;  %v1141_v9 = vmul.f32 %v1286_v1, %v1131_v6  ;;  %v1134_v10 = vmul.f32 %v1486_v7, %v1102_v38 }
 0x56a   : > { %v1488_v11 = vpop.eup %1487 }
 0x56b   : > { %v1156_v12 = vmax.f32 %v1152_v8, 0.0  ;;  %v1151_v13 = vadd.f32 %v1287_v4, %v1141_v9  ;;  %v1144_v14 = vmul.f32 %v1286_v1, %v1134_v10  ;;  %v1133_v15 = vmul.f32 %v1488_v11, %v1101_v42 }
 0x56d   : > { %v1160_v16 = vadd.f32 %v1156_v12, %v1768_v53  ;;  %v1155_v17 = vmax.f32 %v1151_v13, 0.0  ;;  %v1154_v18 = vadd.f32 %v1287_v4, %v1144_v14  ;;  %v1143_v19 = vmul.f32 %v1286_v1, %v1133_v15 }
 0x56f   : > { %1164 = vst.msk [vmem:[%s1708_s15 + $0x8] sm:$0xff] %vm682_vm6, %v1160_v16  ;;  %v1159_v20 = vadd.f32 %v1155_v17, %v1759_v51  ;;  %v1158_v21 = vmax.f32 %v1154_v18, 0.0  ;;  %v1153_v22 = vadd.f32 %v1287_v4, %v1143_v19 }
 0x571   : > { %1163 = vst.msk [vmem:[%s1708_s15] sm:$0xff] %vm682_vm6, %v1159_v20  ;;  %v1162_v23 = vadd.f32 %v1158_v21, %v1778_v55  ;;  %v1157_v24 = vmax.f32 %v1153_v22, 0.0 }
 0x573   : > { %1166 = vst.msk [vmem:[%s1708_s15 + $0x18] sm:$0xff] %vm682_vm6, %v1162_v23  ;;  %v1161_v25 = vadd.f32 %v1157_v24, %v1771_v54 }
 0x575   : > { %1165 = vst.msk [vmem:[%s1708_s15 + $0x10] sm:$0xff] %vm682_vm6, %v1161_v25 }
 0x576 PF: > { %s1908_s4 = sld [smem:[#allocation10_spill]] }
 0x57c   : > { %s49_s0 = sadd.s32 1, %s1908_s4  }
 0x57d   : > { %p46_p7 = scmp.ge.s32.totalorder %s49_s0, 7  }
 0x57f   :  { %48 = sbr.rel (!%p46_p7) target bundleno = 67 (0x43), region = 116 }

// kernel: interaction_gnn_cell.3
= control target key start
LH: loop header
LB: loop body
LE: loop exit
PB: predicated region body
PF: predicated region fallthrough
CT: control target
= control target key end

     0   :  { %s1840_s13 = smov 0   ;;  %s2469_s0 = inlined_call_operand.vmem [shape: f32[384,96], index: 0, kind: input, shape index: {}]   ;;  %s2470_s1 = inlined_call_operand.vmem [shape: f32[384,32], index: 1, kind: input, shape index: {}]   ;;  %s2471_s2 = inlined_call_operand.vmem [shape: f32[96,64], index: 2, kind: input, shape index: {}]   ;;  %s2472_s3 = inlined_call_operand.vmem [shape: f32[1,64], index: 3, kind: input, shape index: {}]   ;;  %s2473_s4 = inlined_call_operand.vmem [shape: f32[1,64], index: 4, kind: input, shape index: {}]   ;;  %s2474_s5 = inlined_call_operand.vmem [shape: f32[1,64], index: 5, kind: input, shape index: {}]   ;;  %s2475_s6 = inlined_call_operand.vmem [shape: f32[64,32], index: 6, kind: input, shape index: {}]   ;;  %s2476_s7 = inlined_call_operand.vmem [shape: f32[1,32], index: 7, kind: input, shape index: {}]   ;;  %s2477_s8 = inlined_call_operand.vmem [shape: f32[1,32], index: 8, kind: input, shape index: {}]   ;;  %s2478_s9 = inlined_call_operand.vmem [shape: f32[1,32], index: 9, kind: input, shape index: {}]   ;;  %s2479_s10 = inlined_call_operand.vmem [shape: f32[384,32], index: 10, kind: output, shape index: {}]  }
   0x1 LB: > { %s1482_s14 = sadd.s32 4294967295, %s1783_s13   ;;  %p1486_p0 = scmp.ge.s32.totalorder %s1783_s13, 1  ;;  %s1783_s13 = sphi %s1840_s13, %s20_s13  }
   0x2   : > { %p324_p1 = scmp.lt.s32.totalorder %s1783_s13, 4 }
   0x4   : > { %p325_p2 = pnand %p1486_p0, %p324_p1 }
   0x5   : > { %s1487_s19 = sshll.u32 (!%p325_p2), %s1482_s14, 4 }
   0x6   : > { %328 = sbr.rel (%p325_p2) target bundleno = 1099 (0x44b), region = 60  ;;  %p368_p3 = scmp.lt.s32.totalorder (!%p325_p2), %s1487_s19, 47 }
   0xb   : > { %v412_v0 = vld [vmem:[%s2471_s2 + $0x58] sm:$0xff]  ;;  %v411_v1 = vld [vmem:[%s2471_s2 + $0x50] sm:$0xff]  ;;  %v410_v2 = vld [vmem:[%s2471_s2 + $0x48] sm:$0xff]  ;;  %s2481_s19 = smov (!%p368_p3, %s1487_s19), 47  ;;  %vm420_vm0 = vcmask 785408   ;;  %vm616_vm1 = vcmask 523264  }
   0xc   : > { %1585 = vmatprep.subr.mxu0 %v412_v0  ;;  %v409_v3 = vld [vmem:[%s2471_s2 + $0x40] sm:$0xff]  ;;  %s1860_s24 = sshll.u32 %s2481_s19, 3  ;;  %v408_v4 = vld [vmem:[%s2471_s2 + $0x38] sm:$0xff]  ;;  %v407_v6 = vld [vmem:[%s2471_s2 + $0x30] sm:$0xff]  ;;  %vm1096_vm2 = vcmask 261120  }
   0xd   : > { %1586 = vmatpush3.msra.mxu0 %v412_v0  ;;  %s1869_s29 = scalar_lea.vmem %s2469_s0, %s1860_s24  ;;  %v406_v7 = vld [vmem:[%s2471_s2 + $0x28] sm:$0xff]  ;;  %v405_v8 = vld [vmem:[%s2471_s2 + $0x20] sm:$0xff]  ;;  %v404_v9 = vld [vmem:[%s2471_s2 + $0x18] sm:$0xff]  ;;  %s2380_s19 = scalar_lea.vmem %s2470_s1, %s1860_s24 }
   0xe   : > { %1587 = vmatprep.subr.mxu0 %v411_v1  ;;  %v385_v5 = vld [vmem:[%s1869_s29] sm:$0xff]  ;;  %v403_v10 = vld [vmem:[%s2471_s2 + $0x10] sm:$0xff]  ;;  %v402_v11 = vld [vmem:[%s2471_s2 + $0x8] sm:$0xff]  ;;  %s2396_s22 = scalar_lea.vmem %s2479_s10, %s1860_s24 }
   0xf   : > { %1588 = vmatpush3.msra.mxu0 %v411_v1  ;;  %1609 = vmatprep.mubr.msk.f32.mxu0 %vm420_vm0, %v385_v5  ;;  %v401_v12 = vld [vmem:[%s2471_s2] sm:$0xff]  ;;  %v386_v13 = vld [vmem:[%s1869_s29 + $0x8] sm:$0xff]  ;;  %v387_v14 = vld [vmem:[%s1869_s29 + $0x10] sm:$0xff] }
  0x10   : > { %1589 = vmatprep.subr.mxu0 %v410_v2  ;;  %v388_v15 = vld [vmem:[%s1869_s29 + $0x18] sm:$0xff]  ;;  %v389_v16 = vld [vmem:[%s1869_s29 + $0x20] sm:$0xff]  ;;  %v390_v17 = vld [vmem:[%s1869_s29 + $0x28] sm:$0xff] }
  0x11   : > { %1590 = vmatpush3.msra.mxu0 %v410_v2  ;;  %v391_v18 = vld [vmem:[%s1869_s29 + $0x30] sm:$0xff]  ;;  %v392_v19 = vld [vmem:[%s1869_s29 + $0x38] sm:$0xff]  ;;  %v393_v20 = vld [vmem:[%s1869_s29 + $0x40] sm:$0xff] }
  0x12   : > { %1591 = vmatprep.subr.mxu0 %v409_v3  ;;  %v394_v21 = vld [vmem:[%s1869_s29 + $0x48] sm:$0xff]  ;;  %v395_v22 = vld [vmem:[%s1869_s29 + $0x50] sm:$0xff]  ;;  %v396_v23 = vld [vmem:[%s1869_s29 + $0x58] sm:$0xff] }
  0x13   : > { %1592 = vmatpush3.msra.mxu0 %v409_v3  ;;  %v397_v24 = vld [vmem:[%s1869_s29 + $0x60] sm:$0xff]  ;;  %v398_v25 = vld [vmem:[%s1869_s29 + $0x68] sm:$0xff]  ;;  %v399_v26 = vld [vmem:[%s1869_s29 + $0x70] sm:$0xff] }
  0x14   : > { %1593 = vmatprep.subr.mxu0 %v408_v4  ;;  %v400_v27 = vld [vmem:[%s1869_s29 + $0x78] sm:$0xff]  ;;  %v1493_v29 = vld [vmem:[%s2472_s3] ss:$0 sm:$0xff] }
  0x15   : > { %1594 = vmatpush3.msra.mxu0 %v408_v4 }
  0x16   : > { %1595 = vmatprep.subr.mxu0 %v407_v6 }
  0x17   : > { %1596 = vmatpush3.msra.mxu0 %v407_v6 }
  0x18   : > { %1597 = vmatprep.subr.mxu0 %v406_v7 }
  0x19   : > { %1598 = vmatpush3.msra.mxu0 %v406_v7 }
  0x1a   : > { %1599 = vmatprep.subr.mxu0 %v405_v8 }
  0x1b   : > { %1600 = vmatpush3.msra.mxu0 %v405_v8 }
  0x1c   : > { %1601 = vmatprep.subr.mxu0 %v404_v9 }
  0x1d   : > { %1602 = vmatpush3.msra.mxu0 %v404_v9 }
  0x1e   : > { %1603 = vmatprep.subr.mxu0 %v403_v10 }
  0x1f   : > { %1604 = vmatpush3.msra.mxu0 %v403_v10 }
  0x20   : > { %1605 = vmatprep.subr.mxu0 %v402_v11 }
  0x21   : > { %1606 = vmatpush3.msra.mxu0 %v402_v11 }
  0x22   : > { %1607 = vmatprep.subr.mxu0 %v401_v12 }
  0x23   : > { %1608 = vmatpush3.msra.mxu0 %v401_v12 }
  0x24   : > { %1610 = vmatmul.mubr.msk.f32.vlgmr.msra.gmra.mxu0 %vm420_vm0, %v386_v13 }
  0x25   : > { %1612 = vmatprep.mubr.msk.f32.mxu0 %vm420_vm0, %v387_v14 }
  0x28   : > { %1613 = vmatmul.mubr.msk.f32.gmra.mxu0 %vm420_vm0, %v388_v15 }
  0x29   : > { %1615 = vmatprep.mubr.msk.f32.mxu0 %vm420_vm0, %v389_v16 }
  0x2c   : > { %1616 = vmatmul.mubr.msk.f32.gmra.mxu0 %vm420_vm0, %v390_v17 }
  0x2d   : > { %1618 = vmatprep.mubr.msk.f32.mxu0 %vm420_vm0, %v391_v18 }
  0x30   : > { %1619 = vmatmul.mubr.msk.f32.gmra.mxu0 %vm420_vm0, %v392_v19 }
  0x31   : > { %1621 = vmatprep.mubr.msk.f32.mxu0 %vm420_vm0, %v393_v20 }
  0x34   : > { %1622 = vmatmul.mubr.msk.f32.gmra.mxu0 %vm420_vm0, %v394_v21 }
  0x35   : > { %1624 = vmatprep.mubr.msk.f32.mxu0 %vm420_vm0, %v395_v22 }
  0x38   : > { %1625 = vmatmul.mubr.msk.f32.gmra.mxu0 %vm420_vm0, %v396_v23 }
  0x39   : > { %1627 = vmatprep.mubr.msk.f32.mxu0 %vm420_vm0, %v397_v24 }
  0x3c   : > { %1628 = vmatmul.mubr.msk.f32.gmra.mxu0 %vm420_vm0, %v398_v25 }
  0x3d   : > { %1630 = vmatprep.mubr.msk.f32.mxu0 %vm420_vm0, %v399_v26 }
  0x40   : > { %1631 = vmatmul.mubr.msk.f32.gmra.mxu0 %vm420_vm0, %v400_v27 }
  0xe4   : > { %v1611_v28 = vpop.f32.mrf.mxu0 }
  0xe5   : > { %v1929_v33 = vadd.f32 %v1611_v28, %v1493_v29 }
  0xe6   : > { %v535_v30 = vpop.f32.mrf.mxu0 }
  0xe7   : > { %v1927_v31 = vadd.f32 %v1493_v29, %v535_v30  ;;  %v620_v40 = vsel %vm616_vm1, %v1929_v33, 0.0 }
  0xe8   : > { %v1614_v32 = vpop.f32.mrf.mxu0 }
  0xe9   : > { %v617_v34 = vsel %vm616_vm1, %v1927_v31, 0.0  ;;  %v1935_v38 = vadd.f32 %v1614_v32, %v1493_v29 }
  0xea   : > { %v545_v35 = vpop.f32.mrf.mxu0  ;;  %618 = vadd.xlane.f32.xlu0 %v617_v34 }
  0xeb   : > { %v1933_v36 = vadd.f32 %v1493_v29, %v545_v35  ;;  %v626_v45 = vsel %vm616_vm1, %v1935_v38, 0.0 }
  0xec   : > { %v1617_v37 = vpop.f32.mrf.mxu0 }
  0xed   : > { %v623_v39 = vsel %vm616_vm1, %v1933_v36, 0.0  ;;  %v1943_v44 = vadd.f32 %v1617_v37, %v1493_v29 }
  0xee   : > { %v555_v41 = vpop.f32.mrf.mxu0  ;;  %624 = vadd.xlane.f32.xlu1 %v623_v39  ;;  %621 = vadd.xlane.f32.xlu0 %v620_v40 }
  0xef   : > { %v1941_v42 = vadd.f32 %v1493_v29, %v555_v41  ;;  %v632_v51 = vsel %vm616_vm1, %v1943_v44, 0.0 }
  0xf0   : > { %v1620_v43 = vpop.f32.mrf.mxu0 }
  0xf1   : > { %v629_v46 = vsel %vm616_vm1, %v1941_v42, 0.0  ;;  %v1951_v50 = vadd.f32 %v1620_v43, %v1493_v29 }
  0xf2   : > { %v565_v47 = vpop.f32.mrf.mxu0  ;;  %627 = vadd.xlane.f32.xlu1 %v626_v45  ;;  %630 = vadd.xlane.f32.xlu0 %v629_v46 }
  0xf3   : > { %v1949_v48 = vadd.f32 %v1493_v29, %v565_v47  ;;  %v638_v57 = vsel %vm616_vm1, %v1951_v50, 0.0 }
  0xf4   : > { %v1623_v49 = vpop.f32.mrf.mxu0 }
  0xf5   : > { %v635_v52 = vsel %vm616_vm1, %v1949_v48, 0.0  ;;  %v1959_v56 = vadd.f32 %v1623_v49, %v1493_v29 }
  0xf6   : > { %v575_v53 = vpop.f32.mrf.mxu0  ;;  %633 = vadd.xlane.f32.xlu1 %v632_v51  ;;  %636 = vadd.xlane.f32.xlu0 %v635_v52 }
  0xf7   : > { %v1957_v54 = vadd.f32 %v1493_v29, %v575_v53  ;;  %v644_v63 = vsel %vm616_vm1, %v1959_v56, 0.0 }
  0xf8   : > { %v1626_v55 = vpop.f32.mrf.mxu0 }
  0xf9   : > { %v641_v58 = vsel %vm616_vm1, %v1957_v54, 0.0  ;;  %v1967_v62 = vadd.f32 %v1626_v55, %v1493_v29 }
  0xfa   : > { %v585_v59 = vpop.f32.mrf.mxu0  ;;  %639 = vadd.xlane.f32.xlu1 %v638_v57  ;;  %642 = vadd.xlane.f32.xlu0 %v641_v58 }
  0xfb   : > { %v1965_v60 = vadd.f32 %v1493_v29, %v585_v59  ;;  %v650_v5 = vsel %vm616_vm1, %v1967_v62, 0.0 }
  0xfc   : > { %v1629_v61 = vpop.f32.mrf.mxu0 }
  0xfd   : > { %v647_v0 = vsel %vm616_vm1, %v1965_v60, 0.0  ;;  %v1975_v4 = vadd.f32 %v1629_v61, %v1493_v29 }
  0xfe   : > { %v595_v1 = vpop.f32.mrf.mxu0  ;;  %645 = vadd.xlane.f32.xlu1 %v644_v63  ;;  %648 = vadd.xlane.f32.xlu0 %v647_v0 }
  0xff   : > { %v1973_v2 = vadd.f32 %v1493_v29, %v595_v1  ;;  %v656_v10 = vsel %vm616_vm1, %v1975_v4, 0.0 }
 0x100   : > { %v1632_v3 = vpop.f32.mrf.mxu0 }
 0x101   : > { %v653_v6 = vsel %vm616_vm1, %v1973_v2, 0.0  ;;  %v1983_v9 = vadd.f32 %v1632_v3, %v1493_v29 }
 0x102   : > { %v605_v7 = vpop.f32.mrf.mxu0  ;;  %651 = vadd.xlane.f32.xlu1 %v650_v5  ;;  %654 = vadd.xlane.f32.xlu0 %v653_v6 }
 0x103   : > { %v1981_v8 = vadd.f32 %v1493_v29, %v605_v7  ;;  %v662_v12 = vsel %vm616_vm1, %v1983_v9, 0.0 }
 0x105   : > { %v659_v11 = vsel %vm616_vm1, %v1981_v8, 0.0 }
 0x106   : > { %657 = vadd.xlane.f32.xlu1 %v656_v10  ;;  %660 = vadd.xlane.f32.xlu0 %v659_v11 }
 0x10a   : > { %663 = vadd.xlane.f32.xlu1 %v662_v12 }
 0x173   : > { %v619_v13 = vpop.xlane.xlu0 %618 }
 0x174   : > { %v666_v14 = vmul.f32 0.015625, %v619_v13 }
 0x176   : > { %v1992_v15 = vsub.f32 %v1927_v31, %v666_v14 }
 0x177   : > { %v625_v16 = vpop.xlane.xlu1 %624  ;;  %v622_v17 = vpop.xlane.xlu0 %621 }
 0x178   : > { %v668_v18 = vmul.f32 0.015625, %v625_v16  ;;  %v667_v19 = vmul.f32 0.015625, %v622_v17  ;;  %v698_v20 = vmul.f32 %v1992_v15, %v1992_v15 }
 0x17a   : > { %v1997_v21 = vsub.f32 %v1933_v36, %v668_v18  ;;  %v2000_v22 = vsub.f32 %v1929_v33, %v667_v19  ;;  %v714_v23 = vsel %vm616_vm1, %v698_v20, 0.0 }
 0x17b   : > { %v628_v24 = vpop.xlane.xlu1 %627  ;;  %715 = vadd.xlane.f32.xlu0 %v714_v23  ;;  %v631_v25 = vpop.xlane.xlu0 %630 }
 0x17c   : > { %v669_v26 = vmul.f32 0.015625, %v628_v24  ;;  %v670_v27 = vmul.f32 0.015625, %v631_v25  ;;  %v700_v28 = vmul.f32 %v1997_v21, %v1997_v21  ;;  %v699_v29 = vmul.f32 %v2000_v22, %v2000_v22 }
 0x17e   : > { %v2008_v30 = vsub.f32 %v1935_v38, %v669_v26  ;;  %v2011_v31 = vsub.f32 %v1941_v42, %v670_v27  ;;  %v720_v32 = vsel %vm616_vm1, %v700_v28, 0.0  ;;  %v717_v33 = vsel %vm616_vm1, %v699_v29, 0.0  ;;  %v893_v27 = vld [vmem:[%s2475_s6 + $0x38] sm:$0xff] }
 0x17f   : > { %v634_v34 = vpop.xlane.xlu1 %633  ;;  %721 = vadd.xlane.f32.xlu0 %v720_v32  ;;  %718 = vadd.xlane.f32.xlu1 %v717_v33  ;;  %v637_v35 = vpop.xlane.xlu0 %636 }
 0x180   : > { %v671_v36 = vmul.f32 0.015625, %v634_v34  ;;  %v672_v37 = vmul.f32 0.015625, %v637_v35  ;;  %v701_v39 = vmul.f32 %v2008_v30, %v2008_v30  ;;  %v702_v38 = vmul.f32 %v2011_v31, %v2011_v31  ;;  %1633 = vmatprep.subr.mxu1 %v893_v27  ;;  %v891_v35 = vld [vmem:[%s2475_s6 + $0x28] sm:$0xff] }
 0x181   : > { %1634 = vmatpush3.msra.mxu1 %v893_v27 }
 0x182   : > { %v2020_v40 = vsub.f32 %v1943_v44, %v671_v36  ;;  %v2023_v41 = vsub.f32 %v1949_v48, %v672_v37  ;;  %v723_v42 = vsel %vm616_vm1, %v701_v39, 0.0  ;;  %v726_v43 = vsel %vm616_vm1, %v702_v38, 0.0  ;;  %v889_v39 = vld [vmem:[%s2475_s6 + $0x18] sm:$0xff]  ;;  %v888_v38 = vld [vmem:[%s2475_s6 + $0x10] sm:$0xff] }
 0x183   : > { %v640_v45 = vpop.xlane.xlu1 %639  ;;  %724 = vadd.xlane.f32.xlu1 %v723_v42  ;;  %727 = vadd.xlane.f32.xlu0 %v726_v43  ;;  %v643_v46 = vpop.xlane.xlu0 %642  ;;  %v887_v42 = vld [vmem:[%s2475_s6 + $0x8] sm:$0xff]  ;;  %v886_v43 = vld [vmem:[%s2475_s6] sm:$0xff] }
 0x184   : > { %v673_v47 = vmul.f32 0.015625, %v640_v45  ;;  %v674_v49 = vmul.f32 0.015625, %v643_v46  ;;  %v703_v51 = vmul.f32 %v2020_v40, %v2020_v40  ;;  %v704_v44 = vmul.f32 %v2023_v41, %v2023_v41 }
 0x186   : > { %v2032_v52 = vsub.f32 %v1951_v50, %v673_v47  ;;  %v2035_v48 = vsub.f32 %v1957_v54, %v674_v49  ;;  %v729_v53 = vsel %vm616_vm1, %v703_v51, 0.0  ;;  %v732_v55 = vsel %vm616_vm1, %v704_v44, 0.0 }
 0x187   : > { %v646_v57 = vpop.xlane.xlu1 %645  ;;  %730 = vadd.xlane.f32.xlu1 %v729_v53  ;;  %733 = vadd.xlane.f32.xlu0 %v732_v55  ;;  %v649_v58 = vpop.xlane.xlu0 %648 }
 0x188   : > { %v675_v59 = vmul.f32 0.015625, %v646_v57  ;;  %v676_v61 = vmul.f32 0.015625, %v649_v58  ;;  %v705_v63 = vmul.f32 %v2032_v52, %v2032_v52  ;;  %v706_v50 = vmul.f32 %v2035_v48, %v2035_v48 }
 0x18a   : > { %v2044_v0 = vsub.f32 %v1959_v56, %v675_v59  ;;  %v2047_v54 = vsub.f32 %v1965_v60, %v676_v61  ;;  %v735_v1 = vsel %vm616_vm1, %v705_v63, 0.0  ;;  %v738_v3 = vsel %vm616_vm1, %v706_v50, 0.0 }
 0x18b   : > { %v652_v5 = vpop.xlane.xlu1 %651  ;;  %736 = vadd.xlane.f32.xlu1 %v735_v1  ;;  %739 = vadd.xlane.f32.xlu0 %v738_v3  ;;  %v655_v6 = vpop.xlane.xlu0 %654 }
 0x18c   : > { %v677_v7 = vmul.f32 0.015625, %v652_v5  ;;  %v678_v10 = vmul.f32 0.015625, %v655_v6  ;;  %v707_v11 = vmul.f32 %v2044_v0, %v2044_v0  ;;  %v708_v56 = vmul.f32 %v2047_v54, %v2047_v54 }
 0x18e   : > { %v2056_v12 = vsub.f32 %v1967_v62, %v677_v7  ;;  %v2059_v60 = vsub.f32 %v1973_v2, %v678_v10  ;;  %v741_v13 = vsel %vm616_vm1, %v707_v11, 0.0  ;;  %v744_v14 = vsel %vm616_vm1, %v708_v56, 0.0 }
 0x18f   : > { %v658_v16 = vpop.xlane.xlu1 %657  ;;  %742 = vadd.xlane.f32.xlu1 %v741_v13  ;;  %745 = vadd.xlane.f32.xlu0 %v744_v14  ;;  %v661_v17 = vpop.xlane.xlu0 %660 }
 0x190   : > { %v679_v18 = vmul.f32 0.015625, %v658_v16  ;;  %v680_v19 = vmul.f32 0.015625, %v661_v17  ;;  %v709_v20 = vmul.f32 %v2056_v12, %v2056_v12  ;;  %v710_v62 = vmul.f32 %v2059_v60, %v2059_v60 }
 0x192   : > { %v2068_v23 = vsub.f32 %v1975_v4, %v679_v18  ;;  %v2071_v2 = vsub.f32 %v1981_v8, %v680_v19  ;;  %v747_v24 = vsel %vm616_vm1, %v709_v20, 0.0  ;;  %v750_v25 = vsel %vm616_vm1, %v710_v62, 0.0  ;;  %v892_v8 = vld [vmem:[%s2475_s6 + $0x30] sm:$0xff]  ;;  %v2114_v18 = vld [vmem:[%s2473_s4] ss:$0 sm:$0xff] }
 0x193   : > { %v664_v26 = vpop.xlane.xlu1 %663  ;;  %748 = vadd.xlane.f32.xlu1 %v747_v24  ;;  %751 = vadd.xlane.f32.xlu0 %v750_v25 }
 0x194   : > { %v681_v28 = vmul.f32 0.015625, %v664_v26  ;;  %v711_v29 = vmul.f32 %v2068_v23, %v2068_v23  ;;  %v712_v4 = vmul.f32 %v2071_v2, %v2071_v2  ;;  %1635 = vmatprep.subr.mxu1 %v892_v8  ;;  %v2120_v26 = vld [vmem:[%s2474_s5] ss:$0 sm:$0xff] }
 0x195   : > { %1636 = vmatpush3.msra.mxu1 %v892_v8 }
 0x196   : > { %v2086_v32 = vsub.f32 %v1983_v9, %v681_v28  ;;  %v753_v33 = vsel %vm616_vm1, %v711_v29, 0.0  ;;  %v756_v34 = vsel %vm616_vm1, %v712_v4, 0.0  ;;  %1637 = vmatprep.subr.mxu1 %v891_v35  ;;  %v890_v9 = vld [vmem:[%s2475_s6 + $0x20] sm:$0xff] }
 0x197   : > { %754 = vadd.xlane.f32.xlu1 %v753_v33  ;;  %757 = vadd.xlane.f32.xlu0 %v756_v34 }
 0x198   : > { %v713_v36 = vmul.f32 %v2086_v32, %v2086_v32  ;;  %1638 = vmatpush3.msra.mxu1 %v891_v35 }
 0x199   : > { %1639 = vmatprep.subr.mxu1 %v890_v9 }
 0x19a   : > { %v759_v37 = vsel %vm616_vm1, %v713_v36, 0.0  ;;  %1640 = vmatpush3.msra.mxu1 %v890_v9 }
 0x19b   : > { %760 = vadd.xlane.f32.xlu1 %v759_v37  ;;  %1641 = vmatprep.subr.mxu1 %v889_v39 }
 0x19c   : > { %1642 = vmatpush3.msra.mxu1 %v889_v39 }
 0x19d   : > { %1643 = vmatprep.subr.mxu1 %v888_v38 }
 0x19e   : > { %1644 = vmatpush3.msra.mxu1 %v888_v38 }
 0x19f   : > { %1645 = vmatprep.subr.mxu1 %v887_v42 }
 0x1a0   : > { %1646 = vmatpush3.msra.mxu1 %v887_v42 }
 0x1a1   : > { %1647 = vmatprep.subr.mxu1 %v886_v43 }
 0x1a2   : > { %1648 = vmatpush3.msra.mxu1 %v886_v43 }
 0x204   : > { %v716_v45 = vpop.xlane.xlu0 %715 }
 0x205   : > { %v762_v46 = vmul.f32 0.015625, %v716_v45 }
 0x207   : > { %v778_v47 = vadd.f32 1e-05, %v762_v46 }
 0x208   : > { %v719_v49 = vpop.xlane.xlu1 %718  ;;  %v722_v51 = vpop.xlane.xlu0 %721 }
 0x209   : > { %1681 = vrsqrt.f32 %v778_v47  ;;  %v763_v44 = vmul.f32 0.015625, %v719_v49  ;;  %v764_v53 = vmul.f32 0.015625, %v722_v51 }
 0x20b   : > { %v779_v55 = vadd.f32 1e-05, %v763_v44  ;;  %v780_v57 = vadd.f32 1e-05, %v764_v53 }
 0x20c   : > { %v725_v58 = vpop.xlane.xlu1 %724  ;;  %v728_v59 = vpop.xlane.xlu0 %727 }
 0x20d   : > { %1683 = vrsqrt.f32 %v779_v55  ;;  %v765_v61 = vmul.f32 0.015625, %v725_v58  ;;  %v766_v63 = vmul.f32 0.015625, %v728_v59 }
 0x20e   : > { %1685 = vrsqrt.f32 %v780_v57 }
 0x20f   : > { %v781_v50 = vadd.f32 1e-05, %v765_v61  ;;  %v782_v1 = vadd.f32 1e-05, %v766_v63 }
 0x210   : > { %v731_v3 = vpop.xlane.xlu1 %730  ;;  %v734_v5 = vpop.xlane.xlu0 %733 }
 0x211   : > { %1687 = vrsqrt.f32 %v781_v50  ;;  %v767_v6 = vmul.f32 0.015625, %v731_v3  ;;  %v768_v7 = vmul.f32 0.015625, %v734_v5 }
 0x212   : > { %1689 = vrsqrt.f32 %v782_v1 }
 0x213   : > { %v783_v10 = vadd.f32 1e-05, %v767_v6  ;;  %v784_v11 = vadd.f32 1e-05, %v768_v7 }
 0x214   : > { %v737_v56 = vpop.xlane.xlu1 %736  ;;  %v740_v13 = vpop.xlane.xlu0 %739 }
 0x215   : > { %1691 = vrsqrt.f32 %v783_v10  ;;  %v769_v14 = vmul.f32 0.015625, %v737_v56  ;;  %v770_v16 = vmul.f32 0.015625, %v740_v13 }
 0x216   : > { %v1682_v17 = vpop.eup %1681  ;;  %1693 = vrsqrt.f32 %v784_v11 }
 0x217   : > { %v785_v19 = vadd.f32 1e-05, %v769_v14  ;;  %v786_v20 = vadd.f32 1e-05, %v770_v16  ;;  %v810_v62 = vmul.f32 %v1682_v17, %v1992_v15 }
 0x218   : > { %v743_v24 = vpop.xlane.xlu1 %742  ;;  %v746_v25 = vpop.xlane.xlu0 %745 }
 0x219   : > { %1695 = vrsqrt.f32 %v785_v19  ;;  %v771_v27 = vmul.f32 0.015625, %v743_v24  ;;  %v772_v28 = vmul.f32 0.015625, %v746_v25  ;;  %v832_v29 = vmul.f32 %v2114_v18, %v810_v62 }
 0x21a   : > { %v1684_v4 = vpop.eup %1683  ;;  %1697 = vrsqrt.f32 %v786_v20 }
 0x21b   : > { %v1686_v8 = vpop.eup %1685  ;;  %v787_v33 = vadd.f32 1e-05, %v771_v27  ;;  %v788_v34 = vadd.f32 1e-05, %v772_v28  ;;  %v854_v35 = vadd.f32 %v2120_v26, %v832_v29  ;;  %v811_v15 = vmul.f32 %v1684_v4, %v2000_v22 }
 0x21c   : > { %v749_v36 = vpop.xlane.xlu1 %748  ;;  %v752_v9 = vpop.xlane.xlu0 %751  ;;  %v812_v37 = vmul.f32 %v1686_v8, %v1997_v21 }
 0x21d   : > { %1699 = vrsqrt.f32 %v787_v33  ;;  %v773_v39 = vmul.f32 0.015625, %v749_v36  ;;  %v774_v38 = vmul.f32 0.015625, %v752_v9  ;;  %v870_v42 = vmax.f32 %v854_v35, 0.0 }
 0x21e   : > { %v1688_v43 = vpop.eup %1687  ;;  %1701 = vrsqrt.f32 %v788_v34  ;;  %v833_v45 = vmul.f32 %v2114_v18, %v811_v15  ;;  %v834_v46 = vmul.f32 %v2114_v18, %v812_v37 }
 0x21f   : > { %v1690_v47 = vpop.eup %1689  ;;  %v789_v49 = vadd.f32 1e-05, %v773_v39  ;;  %v790_v51 = vadd.f32 1e-05, %v774_v38  ;;  %1649 = vmatprep.mubr.msk.f32.mxu1 %vm616_vm1, %v870_v42  ;;  %v813_v22 = vmul.f32 %v1688_v43, %v2008_v30 }
 0x220   : > { %v755_v44 = vpop.xlane.xlu1 %754  ;;  %v758_v53 = vpop.xlane.xlu0 %757  ;;  %v855_v21 = vadd.f32 %v2120_v26, %v833_v45  ;;  %v856_v55 = vadd.f32 %v2120_v26, %v834_v46  ;;  %v814_v57 = vmul.f32 %v1690_v47, %v2011_v31 }
 0x221   : > { %1703 = vrsqrt.f32 %v789_v49  ;;  %v775_v58 = vmul.f32 0.015625, %v755_v44  ;;  %v776_v59 = vmul.f32 0.015625, %v758_v53  ;;  %v835_v61 = vmul.f32 %v2114_v18, %v813_v22 }
 0x222   : > { %v1692_v63 = vpop.eup %1691  ;;  %1705 = vrsqrt.f32 %v790_v51  ;;  %v871_v50 = vmax.f32 %v855_v21, 0.0  ;;  %v872_v1 = vmax.f32 %v856_v55, 0.0  ;;  %v836_v3 = vmul.f32 %v2114_v18, %v814_v57 }
 0x223   : > { %v1694_v30 = vpop.eup %1693  ;;  %v791_v5 = vadd.f32 1e-05, %v775_v58  ;;  %v792_v6 = vadd.f32 1e-05, %v776_v59  ;;  %v857_v7 = vadd.f32 %v2120_v26, %v835_v61  ;;  %v815_v10 = vmul.f32 %v1692_v63, %v2020_v40 }
 0x224   : > { %1650 = vmatmul.mubr.msk.f32.vlgmr.msra.gmra.mxu1 %vm616_vm1, %v871_v50  ;;  %v761_v31 = vpop.xlane.xlu1 %760  ;;  %v858_v11 = vadd.f32 %v2120_v26, %v836_v3  ;;  %v816_v56 = vmul.f32 %v1694_v30, %v2023_v41 }
 0x225   : > { %1707 = vrsqrt.f32 %v791_v5  ;;  %v777_v13 = vmul.f32 0.015625, %v761_v31  ;;  %1652 = vmatprep.mubr.msk.f32.mxu1 %vm616_vm1, %v872_v1  ;;  %v873_v14 = vmax.f32 %v857_v7, 0.0  ;;  %v837_v16 = vmul.f32 %v2114_v18, %v815_v10 }
 0x226   : > { %v1696_v17 = vpop.eup %1695  ;;  %1709 = vrsqrt.f32 %v792_v6  ;;  %v874_v19 = vmax.f32 %v858_v11, 0.0  ;;  %v838_v20 = vmul.f32 %v2114_v18, %v816_v56 }
 0x227   : > { %v1698_v40 = vpop.eup %1697  ;;  %v793_v62 = vadd.f32 1e-05, %v777_v13  ;;  %v859_v24 = vadd.f32 %v2120_v26, %v837_v16  ;;  %v817_v25 = vmul.f32 %v1696_v17, %v2032_v52 }
 0x228   : > { %1653 = vmatmul.mubr.msk.f32.gmra.mxu1 %vm616_vm1, %v873_v14  ;;  %v860_v41 = vadd.f32 %v2120_v26, %v838_v20  ;;  %v818_v27 = vmul.f32 %v1698_v40, %v2035_v48 }
 0x229   : > { %1711 = vrsqrt.f32 %v793_v62  ;;  %1655 = vmatprep.mubr.msk.f32.mxu1 %vm616_vm1, %v874_v19  ;;  %v875_v28 = vmax.f32 %v859_v24, 0.0  ;;  %v839_v29 = vmul.f32 %v2114_v18, %v817_v25 }
 0x22a   : > { %v1700_v4 = vpop.eup %1699  ;;  %v876_v8 = vmax.f32 %v860_v41, 0.0  ;;  %v840_v33 = vmul.f32 %v2114_v18, %v818_v27 }
 0x22b   : > { %v1702_v34 = vpop.eup %1701  ;;  %v861_v35 = vadd.f32 %v2120_v26, %v839_v29  ;;  %v819_v52 = vmul.f32 %v1700_v4, %v2044_v0 }
 0x22c   : > { %1656 = vmatmul.mubr.msk.f32.gmra.mxu1 %vm616_vm1, %v875_v28  ;;  %v862_v15 = vadd.f32 %v2120_v26, %v840_v33  ;;  %v820_v48 = vmul.f32 %v1702_v34, %v2047_v54 }
 0x22d   : > { %1658 = vmatprep.mubr.msk.f32.mxu1 %vm616_vm1, %v876_v8  ;;  %v877_v36 = vmax.f32 %v861_v35, 0.0  ;;  %v841_v9 = vmul.f32 %v2114_v18, %v819_v52 }
 0x22e   : > { %v1704_v37 = vpop.eup %1703  ;;  %v878_v39 = vmax.f32 %v862_v15, 0.0  ;;  %v842_v38 = vmul.f32 %v2114_v18, %v820_v48 }
 0x22f   : > { %v1706_v42 = vpop.eup %1705  ;;  %v863_v43 = vadd.f32 %v2120_v26, %v841_v9  ;;  %v821_v0 = vmul.f32 %v1704_v37, %v2056_v12 }
 0x230   : > { %1659 = vmatmul.mubr.msk.f32.gmra.mxu1 %vm616_vm1, %v877_v36  ;;  %v864_v45 = vadd.f32 %v2120_v26, %v842_v38  ;;  %v822_v54 = vmul.f32 %v1706_v42, %v2059_v60 }
 0x231   : > { %1661 = vmatprep.mubr.msk.f32.mxu1 %vm616_vm1, %v878_v39  ;;  %v879_v46 = vmax.f32 %v863_v43, 0.0  ;;  %v843_v47 = vmul.f32 %v2114_v18, %v821_v0 }
 0x232   : > { %v1708_v49 = vpop.eup %1707  ;;  %v880_v51 = vmax.f32 %v864_v45, 0.0  ;;  %v844_v22 = vmul.f32 %v2114_v18, %v822_v54 }
 0x233   : > { %v1710_v44 = vpop.eup %1709  ;;  %v865_v53 = vadd.f32 %v2120_v26, %v843_v47  ;;  %v823_v12 = vmul.f32 %v1708_v49, %v2068_v23 }
 0x234   : > { %1662 = vmatmul.mubr.msk.f32.gmra.mxu1 %vm616_vm1, %v879_v46  ;;  %v866_v21 = vadd.f32 %v2120_v26, %v844_v22  ;;  %v824_v60 = vmul.f32 %v1710_v44, %v2071_v2 }
 0x235   : > { %1664 = vmatprep.mubr.msk.f32.mxu1 %vm616_vm1, %v880_v51  ;;  %v881_v55 = vmax.f32 %v865_v53, 0.0  ;;  %v845_v57 = vmul.f32 %v2114_v18, %v823_v12 }
 0x236   : > { %v1712_v58 = vpop.eup %1711  ;;  %v882_v59 = vmax.f32 %v866_v21, 0.0  ;;  %v846_v61 = vmul.f32 %v2114_v18, %v824_v60 }
 0x237   : > { %v867_v63 = vadd.f32 %v2120_v26, %v845_v57  ;;  %v825_v50 = vmul.f32 %v1712_v58, %v2086_v32  ;;  %v1512_v32 = vld [vmem:[%s2476_s7] ss:$0 sm:$0xff] }
 0x238   : > { %1665 = vmatmul.mubr.msk.f32.gmra.mxu1 %vm616_vm1, %v881_v55  ;;  %v868_v23 = vadd.f32 %v2120_v26, %v846_v61 }
 0x239   : > { %1667 = vmatprep.mubr.msk.f32.mxu1 %vm616_vm1, %v882_v59  ;;  %v883_v2 = vmax.f32 %v867_v63, 0.0  ;;  %v847_v1 = vmul.f32 %v2114_v18, %v825_v50 }
 0x23a   : > { %v884_v3 = vmax.f32 %v868_v23, 0.0 }
 0x23b   : > { %v869_v30 = vadd.f32 %v2120_v26, %v847_v1 }
 0x23c   : > { %1668 = vmatmul.mubr.msk.f32.gmra.mxu1 %vm616_vm1, %v883_v2 }
 0x23d   : > { %1670 = vmatprep.mubr.msk.f32.mxu1 %vm616_vm1, %v884_v3  ;;  %v885_v5 = vmax.f32 %v869_v30, 0.0 }
 0x240   : > { %1671 = vmatmul.mubr.msk.f32.gmra.mxu1 %vm616_vm1, %v885_v5 }
 0x2e4   : > { %v1651_v6 = vpop.f32.mrf.mxu1 }
 0x2e5   : > { %v2188_v7 = vadd.f32 %v1651_v6, %v1512_v32 }
 0x2e6   : > { %v1015_v10 = vpop.f32.mrf.mxu1 }
 0x2e7   : > { %v2190_v18 = vadd.f32 %v1512_v32, %v1015_v10  ;;  %v1100_v26 = vsel %vm1096_vm2, %v2188_v7, 0.0 }
 0x2e8   : > { %1101 = vadd.xlane.f32.xlu1 %v1100_v26  ;;  %v1654_v31 = vpop.f32.mrf.mxu1 }
 0x2e9   : > { %v2194_v11 = vadd.f32 %v1654_v31, %v1512_v32  ;;  %v1097_v56 = vsel %vm1096_vm2, %v2190_v18, 0.0 }
 0x2ea   : > { %1098 = vadd.xlane.f32.xlu0 %v1097_v56  ;;  %v1025_v13 = vpop.f32.mrf.mxu1 }
 0x2eb   : > { %v2198_v14 = vadd.f32 %v1512_v32, %v1025_v13  ;;  %v1106_v16 = vsel %vm1096_vm2, %v2194_v11, 0.0 }
 0x2ec   : > { %1107 = vadd.xlane.f32.xlu1 %v1106_v16  ;;  %v1657_v17 = vpop.f32.mrf.mxu1 }
 0x2ed   : > { %v2202_v19 = vadd.f32 %v1657_v17, %v1512_v32  ;;  %v1103_v20 = vsel %vm1096_vm2, %v2198_v14, 0.0 }
 0x2ee   : > { %1104 = vadd.xlane.f32.xlu0 %v1103_v20  ;;  %v1035_v40 = vpop.f32.mrf.mxu1 }
 0x2ef   : > { %v2206_v62 = vadd.f32 %v1512_v32, %v1035_v40  ;;  %v1112_v24 = vsel %vm1096_vm2, %v2202_v19, 0.0 }
 0x2f0   : > { %1113 = vadd.xlane.f32.xlu1 %v1112_v24  ;;  %v1660_v25 = vpop.f32.mrf.mxu1 }
 0x2f1   : > { %v2210_v41 = vadd.f32 %v1660_v25, %v1512_v32  ;;  %v1109_v27 = vsel %vm1096_vm2, %v2206_v62, 0.0 }
 0x2f2   : > { %1110 = vadd.xlane.f32.xlu0 %v1109_v27  ;;  %v1045_v28 = vpop.f32.mrf.mxu1 }
 0x2f3   : > { %v2214_v29 = vadd.f32 %v1512_v32, %v1045_v28  ;;  %v1118_v4 = vsel %vm1096_vm2, %v2210_v41, 0.0 }
 0x2f4   : > { %1119 = vadd.xlane.f32.xlu1 %v1118_v4  ;;  %v1663_v8 = vpop.f32.mrf.mxu1 }
 0x2f5   : > { %v2218_v33 = vadd.f32 %v1663_v8, %v1512_v32  ;;  %v1115_v34 = vsel %vm1096_vm2, %v2214_v29, 0.0 }
 0x2f6   : > { %1116 = vadd.xlane.f32.xlu0 %v1115_v34  ;;  %v1055_v35 = vpop.f32.mrf.mxu1 }
 0x2f7   : > { %v2222_v52 = vadd.f32 %v1512_v32, %v1055_v35  ;;  %v1124_v15 = vsel %vm1096_vm2, %v2218_v33, 0.0 }
 0x2f8   : > { %1125 = vadd.xlane.f32.xlu1 %v1124_v15  ;;  %v1666_v48 = vpop.f32.mrf.mxu1 }
 0x2f9   : > { %v2226_v36 = vadd.f32 %v1666_v48, %v1512_v32  ;;  %v1121_v9 = vsel %vm1096_vm2, %v2222_v52, 0.0 }
 0x2fa   : > { %1122 = vadd.xlane.f32.xlu0 %v1121_v9  ;;  %v1065_v37 = vpop.f32.mrf.mxu1 }
 0x2fb   : > { %v2230_v39 = vadd.f32 %v1512_v32, %v1065_v37  ;;  %v1130_v38 = vsel %vm1096_vm2, %v2226_v36, 0.0 }
 0x2fc   : > { %1131 = vadd.xlane.f32.xlu1 %v1130_v38  ;;  %v1669_v42 = vpop.f32.mrf.mxu1 }
 0x2fd   : > { %v2234_v43 = vadd.f32 %v1669_v42, %v1512_v32  ;;  %v1127_v0 = vsel %vm1096_vm2, %v2230_v39, 0.0 }
 0x2fe   : > { %1128 = vadd.xlane.f32.xlu0 %v1127_v0  ;;  %v1075_v45 = vpop.f32.mrf.mxu1 }
 0x2ff   : > { %v2238_v54 = vadd.f32 %v1512_v32, %v1075_v45  ;;  %v1136_v46 = vsel %vm1096_vm2, %v2234_v43, 0.0 }
 0x300   : > { %1137 = vadd.xlane.f32.xlu1 %v1136_v46  ;;  %v1672_v47 = vpop.f32.mrf.mxu1 }
 0x301   : > { %v2242_v49 = vadd.f32 %v1672_v47, %v1512_v32  ;;  %v1133_v51 = vsel %vm1096_vm2, %v2238_v54, 0.0 }
 0x302   : > { %1134 = vadd.xlane.f32.xlu0 %v1133_v51  ;;  %v1085_v22 = vpop.f32.mrf.mxu1 }
 0x303   : > { %v2246_v44 = vadd.f32 %v1512_v32, %v1085_v22  ;;  %v1142_v53 = vsel %vm1096_vm2, %v2242_v49, 0.0 }
 0x304   : > { %1143 = vadd.xlane.f32.xlu1 %v1142_v53 }
 0x305   : > { %v1139_v12 = vsel %vm1096_vm2, %v2246_v44, 0.0 }
 0x306   : > { %1140 = vadd.xlane.f32.xlu0 %v1139_v12 }
 0x371   : > { %v1102_v21 = vpop.xlane.xlu1 %1101 }
 0x372   : > { %v1147_v60 = vmul.f32 0.03125, %v1102_v21 }
 0x373   : > { %v1099_v55 = vpop.xlane.xlu0 %1098 }
 0x374   : > { %v2253_v57 = vsub.f32 %v2188_v7, %v1147_v60  ;;  %v1146_v58 = vmul.f32 0.03125, %v1099_v55 }
 0x375   : > { %v1108_v59 = vpop.xlane.xlu1 %1107 }
 0x376   : > { %v2256_v61 = vsub.f32 %v2190_v18, %v1146_v58  ;;  %v1149_v63 = vmul.f32 0.03125, %v1108_v59  ;;  %v1179_v50 = vmul.f32 %v2253_v57, %v2253_v57 }
 0x377   : > { %v1105_v23 = vpop.xlane.xlu0 %1104 }
 0x378   : > { %v2261_v2 = vsub.f32 %v2194_v11, %v1149_v63  ;;  %v1148_v1 = vmul.f32 0.03125, %v1105_v23  ;;  %v1197_v3 = vsel %vm1096_vm2, %v1179_v50, 0.0  ;;  %v1178_v30 = vmul.f32 %v2256_v61, %v2256_v61 }
 0x379   : > { %v1114_v5 = vpop.xlane.xlu1 %1113  ;;  %1198 = vadd.xlane.f32.xlu1 %v1197_v3 }
 0x37a   : > { %v2267_v32 = vsub.f32 %v2198_v14, %v1148_v1  ;;  %v1151_v6 = vmul.f32 0.03125, %v1114_v5  ;;  %v1194_v7 = vsel %vm1096_vm2, %v1178_v30, 0.0  ;;  %v1181_v10 = vmul.f32 %v2261_v2, %v2261_v2 }
 0x37b   : > { %1195 = vadd.xlane.f32.xlu0 %v1194_v7  ;;  %v1111_v18 = vpop.xlane.xlu0 %1110 }
 0x37c   : > { %v2273_v26 = vsub.f32 %v2202_v19, %v1151_v6  ;;  %v1150_v31 = vmul.f32 0.03125, %v1111_v18  ;;  %v1203_v11 = vsel %vm1096_vm2, %v1181_v10, 0.0  ;;  %v1180_v56 = vmul.f32 %v2267_v32, %v2267_v32 }
 0x37d   : > { %v1120_v13 = vpop.xlane.xlu1 %1119  ;;  %1204 = vadd.xlane.f32.xlu1 %v1203_v11 }
 0x37e   : > { %v2279_v14 = vsub.f32 %v2206_v62, %v1150_v31  ;;  %v1153_v16 = vmul.f32 0.03125, %v1120_v13  ;;  %v1200_v17 = vsel %vm1096_vm2, %v1180_v56, 0.0  ;;  %v1183_v20 = vmul.f32 %v2273_v26, %v2273_v26 }
 0x37f   : > { %1201 = vadd.xlane.f32.xlu0 %v1200_v17  ;;  %v1117_v19 = vpop.xlane.xlu0 %1116 }
 0x380   : > { %v2285_v40 = vsub.f32 %v2210_v41, %v1153_v16  ;;  %v1152_v24 = vmul.f32 0.03125, %v1117_v19  ;;  %v1209_v25 = vsel %vm1096_vm2, %v1183_v20, 0.0  ;;  %v1182_v27 = vmul.f32 %v2279_v14, %v2279_v14 }
 0x381   : > { %v1126_v28 = vpop.xlane.xlu1 %1125  ;;  %1210 = vadd.xlane.f32.xlu1 %v1209_v25 }
 0x382   : > { %v2291_v62 = vsub.f32 %v2214_v29, %v1152_v24  ;;  %v1155_v4 = vmul.f32 0.03125, %v1126_v28  ;;  %v1206_v8 = vsel %vm1096_vm2, %v1182_v27, 0.0  ;;  %v1185_v34 = vmul.f32 %v2285_v40, %v2285_v40 }
 0x383   : > { %1207 = vadd.xlane.f32.xlu0 %v1206_v8  ;;  %v1123_v41 = vpop.xlane.xlu0 %1122 }
 0x384   : > { %v2297_v35 = vsub.f32 %v2218_v33, %v1155_v4  ;;  %v1154_v15 = vmul.f32 0.03125, %v1123_v41  ;;  %v1215_v48 = vsel %vm1096_vm2, %v1185_v34, 0.0  ;;  %v1184_v9 = vmul.f32 %v2291_v62, %v2291_v62 }
 0x385   : > { %v1132_v37 = vpop.xlane.xlu1 %1131  ;;  %1216 = vadd.xlane.f32.xlu1 %v1215_v48 }
 0x386   : > { %v2303_v29 = vsub.f32 %v2222_v52, %v1154_v15  ;;  %v1157_v38 = vmul.f32 0.03125, %v1132_v37  ;;  %v1212_v42 = vsel %vm1096_vm2, %v1184_v9, 0.0  ;;  %v1187_v0 = vmul.f32 %v2297_v35, %v2297_v35 }
 0x387   : > { %1213 = vadd.xlane.f32.xlu0 %v1212_v42  ;;  %v1129_v33 = vpop.xlane.xlu0 %1128 }
 0x388   : > { %v2309_v45 = vsub.f32 %v2226_v36, %v1157_v38  ;;  %v1156_v46 = vmul.f32 0.03125, %v1129_v33  ;;  %v1221_v47 = vsel %vm1096_vm2, %v1187_v0, 0.0  ;;  %v1186_v51 = vmul.f32 %v2303_v29, %v2303_v29 }
 0x389   : > { %v1138_v22 = vpop.xlane.xlu1 %1137  ;;  %1222 = vadd.xlane.f32.xlu1 %v1221_v47 }
 0x38a   : > { %v2315_v52 = vsub.f32 %v2230_v39, %v1156_v46  ;;  %v1159_v53 = vmul.f32 0.03125, %v1138_v22  ;;  %v1218_v12 = vsel %vm1096_vm2, %v1186_v51, 0.0  ;;  %v1189_v21 = vmul.f32 %v2309_v45, %v2309_v45  ;;  %v2351_v22 = vld [vmem:[%s2477_s8] ss:$0 sm:$0xff] }
 0x38b   : > { %1219 = vadd.xlane.f32.xlu0 %v1218_v12  ;;  %v1135_v36 = vpop.xlane.xlu0 %1134 }
 0x38c   : > { %v2321_v60 = vsub.f32 %v2234_v43, %v1159_v53  ;;  %v1158_v55 = vmul.f32 0.03125, %v1135_v36  ;;  %v1227_v58 = vsel %vm1096_vm2, %v1189_v21, 0.0  ;;  %v1188_v59 = vmul.f32 %v2315_v52, %v2315_v52 }
 0x38d   : > { %1228 = vadd.xlane.f32.xlu1 %v1227_v58  ;;  %v1144_v39 = vpop.xlane.xlu1 %1143  ;;  %v2357_v58 = vld [vmem:[%s2478_s9] ss:$0 sm:$0xff] }
 0x38e   : > { %v2327_v63 = vsub.f32 %v2238_v54, %v1158_v55  ;;  %v1161_v50 = vmul.f32 0.03125, %v1144_v39  ;;  %v1224_v23 = vsel %vm1096_vm2, %v1188_v59, 0.0  ;;  %v1191_v1 = vmul.f32 %v2321_v60, %v2321_v60 }
 0x38f   : > { %1225 = vadd.xlane.f32.xlu0 %v1224_v23  ;;  %v1141_v43 = vpop.xlane.xlu0 %1140 }
 0x390   : > { %v2333_v3 = vsub.f32 %v2242_v49, %v1161_v50  ;;  %v1160_v30 = vmul.f32 0.03125, %v1141_v43  ;;  %v1233_v5 = vsel %vm1096_vm2, %v1191_v1, 0.0  ;;  %v1190_v6 = vmul.f32 %v2327_v63, %v2327_v63 }
 0x391   : > { %1234 = vadd.xlane.f32.xlu1 %v1233_v5 }
 0x392   : > { %v2339_v54 = vsub.f32 %v2246_v44, %v1160_v30  ;;  %v1230_v7 = vsel %vm1096_vm2, %v1190_v6, 0.0  ;;  %v1193_v10 = vmul.f32 %v2333_v3, %v2333_v3 }
 0x393   : > { %1231 = vadd.xlane.f32.xlu0 %v1230_v7 }
 0x394   : > { %v1239_v18 = vsel %vm1096_vm2, %v1193_v10, 0.0  ;;  %v1192_v49 = vmul.f32 %v2339_v54, %v2339_v54 }
 0x395   : > { %1240 = vadd.xlane.f32.xlu1 %v1239_v18 }
 0x396   : > { %v1236_v31 = vsel %vm1096_vm2, %v1192_v49, 0.0 }
 0x397   : > { %1237 = vadd.xlane.f32.xlu0 %v1236_v31 }
 0x402   : > { %v1199_v11 = vpop.xlane.xlu1 %1198 }
 0x403   : > { %v1243_v56 = vmul.f32 0.03125, %v1199_v11 }
 0x404   : > { %v1196_v13 = vpop.xlane.xlu0 %1195 }
 0x405   : > { %v1259_v44 = vadd.f32 1e-05, %v1243_v56  ;;  %v1242_v16 = vmul.f32 0.03125, %v1196_v13 }
 0x406   : > { %v1205_v17 = vpop.xlane.xlu1 %1204 }
 0x407   : > { %1713 = vrsqrt.f32 %v1259_v44  ;;  %v1258_v20 = vadd.f32 1e-05, %v1242_v16  ;;  %v1245_v19 = vmul.f32 0.03125, %v1205_v17 }
 0x408   : > { %v1202_v24 = vpop.xlane.xlu0 %1201 }
 0x409   : > { %1715 = vrsqrt.f32 %v1258_v20  ;;  %v1261_v25 = vadd.f32 1e-05, %v1245_v19  ;;  %v1244_v27 = vmul.f32 0.03125, %v1202_v24 }
 0x40a   : > { %v1211_v28 = vpop.xlane.xlu1 %1210 }
 0x40b   : > { %1717 = vrsqrt.f32 %v1261_v25  ;;  %v1260_v4 = vadd.f32 1e-05, %v1244_v27  ;;  %v1247_v8 = vmul.f32 0.03125, %v1211_v28 }
 0x40c   : > { %v1208_v34 = vpop.xlane.xlu0 %1207 }
 0x40d   : > { %1719 = vrsqrt.f32 %v1260_v4  ;;  %v1263_v41 = vadd.f32 1e-05, %v1247_v8  ;;  %v1246_v15 = vmul.f32 0.03125, %v1208_v34 }
 0x40e   : > { %v1217_v48 = vpop.xlane.xlu1 %1216 }
 0x40f   : > { %1721 = vrsqrt.f32 %v1263_v41  ;;  %v1262_v9 = vadd.f32 1e-05, %v1246_v15  ;;  %v1249_v37 = vmul.f32 0.03125, %v1217_v48 }
 0x410   : > { %v1214_v38 = vpop.xlane.xlu0 %1213 }
 0x411   : > { %1723 = vrsqrt.f32 %v1262_v9  ;;  %v1265_v42 = vadd.f32 1e-05, %v1249_v37  ;;  %v1248_v0 = vmul.f32 0.03125, %v1214_v38 }
 0x412   : > { %v1223_v33 = vpop.xlane.xlu1 %1222 }
 0x413   : > { %1725 = vrsqrt.f32 %v1265_v42  ;;  %v1264_v46 = vadd.f32 1e-05, %v1248_v0  ;;  %v1251_v47 = vmul.f32 0.03125, %v1223_v33 }
 0x414   : > { %v1714_v51 = vpop.eup %1713  ;;  %v1220_v53 = vpop.xlane.xlu0 %1219 }
 0x415   : > { %v1291_v12 = vmul.f32 %v1714_v51, %v2253_v57  ;;  %1727 = vrsqrt.f32 %v1264_v46  ;;  %v1267_v21 = vadd.f32 1e-05, %v1251_v47  ;;  %v1250_v36 = vmul.f32 0.03125, %v1220_v53 }
 0x416   : > { %v1716_v55 = vpop.eup %1715  ;;  %v1229_v59 = vpop.xlane.xlu1 %1228 }
 0x417   : > { %v1313_v39 = vmul.f32 %v2351_v22, %v1291_v12  ;;  %v1290_v50 = vmul.f32 %v1716_v55, %v2256_v61  ;;  %1729 = vrsqrt.f32 %v1267_v21  ;;  %v1266_v23 = vadd.f32 1e-05, %v1250_v36  ;;  %v1367_v21 = vld [vmem:[%s2380_s19 + $0x8] sm:$0xff] }
 0x418   : > { %v1718_v1 = vpop.eup %1717  ;;  %v1253_v43 = vmul.f32 0.03125, %v1229_v59  ;;  %v1226_v30 = vpop.xlane.xlu0 %1225 }
 0x419   : > { %v1335_v57 = vadd.f32 %v2357_v58, %v1313_v39  ;;  %v1312_v5 = vmul.f32 %v2351_v22, %v1290_v50  ;;  %v1293_v6 = vmul.f32 %v1718_v1, %v2261_v2  ;;  %1731 = vrsqrt.f32 %v1266_v23 }
 0x41a   : > { %v1720_v7 = vpop.eup %1719  ;;  %v1269_v10 = vadd.f32 1e-05, %v1253_v43  ;;  %v1252_v18 = vmul.f32 0.03125, %v1226_v30  ;;  %v1235_v49 = vpop.xlane.xlu1 %1234  ;;  %v1369_v30 = vld [vmem:[%s2380_s19 + $0x18] sm:$0xff] }
 0x41b   : > { %1733 = vtanh.f32 %v1335_v57  ;;  %v1334_v31 = vadd.f32 %v2357_v58, %v1312_v5  ;;  %v1315_v61 = vmul.f32 %v2351_v22, %v1293_v6  ;;  %v1292_v11 = vmul.f32 %v1720_v7, %v2267_v32 }
 0x41c   : > { %v1722_v56 = vpop.eup %1721  ;;  %1735 = vrsqrt.f32 %v1269_v10  ;;  %v1268_v13 = vadd.f32 1e-05, %v1252_v18  ;;  %v1255_v44 = vmul.f32 0.03125, %v1235_v49  ;;  %v1232_v16 = vpop.xlane.xlu0 %1231  ;;  %v1368_v10 = vld [vmem:[%s2380_s19 + $0x10] sm:$0xff] }
 0x41d   : > { %1737 = vtanh.f32 %v1334_v31  ;;  %v1337_v2 = vadd.f32 %v2357_v58, %v1315_v61  ;;  %v1314_v17 = vmul.f32 %v2351_v22, %v1292_v11  ;;  %v1295_v20 = vmul.f32 %v1722_v56, %v2273_v26  ;;  %v1371_v11 = vld [vmem:[%s2380_s19 + $0x28] sm:$0xff] }
 0x41e   : > { %v1724_v19 = vpop.eup %1723  ;;  %1739 = vrsqrt.f32 %v1268_v13  ;;  %v1271_v24 = vadd.f32 1e-05, %v1255_v44  ;;  %v1254_v25 = vmul.f32 0.03125, %v1232_v16  ;;  %v1241_v27 = vpop.xlane.xlu1 %1240 }
 0x41f   : > { %1741 = vtanh.f32 %v1337_v2  ;;  %v1336_v32 = vadd.f32 %v2357_v58, %v1314_v17  ;;  %v1317_v28 = vmul.f32 %v2351_v22, %v1295_v20  ;;  %v1294_v4 = vmul.f32 %v1724_v19, %v2279_v14  ;;  %v1370_v17 = vld [vmem:[%s2380_s19 + $0x20] sm:$0xff] }
 0x420   : > { %v1726_v8 = vpop.eup %1725  ;;  %1743 = vrsqrt.f32 %v1271_v24  ;;  %v1270_v34 = vadd.f32 1e-05, %v1254_v25  ;;  %v1257_v41 = vmul.f32 0.03125, %v1241_v27  ;;  %v1238_v15 = vpop.xlane.xlu0 %1237 }
 0x421   : > { %1745 = vtanh.f32 %v1336_v32  ;;  %v1339_v26 = vadd.f32 %v2357_v58, %v1317_v28  ;;  %v1316_v48 = vmul.f32 %v2351_v22, %v1294_v4  ;;  %v1297_v9 = vmul.f32 %v1726_v8, %v2285_v40  ;;  %v1373_v32 = vld [vmem:[%s2380_s19 + $0x38] sm:$0xff] }
 0x422   : > { %v1728_v37 = vpop.eup %1727  ;;  %1747 = vrsqrt.f32 %v1270_v34  ;;  %v1273_v38 = vadd.f32 1e-05, %v1257_v41  ;;  %v1256_v42 = vmul.f32 0.03125, %v1238_v15  ;;  %v1372_v15 = vld [vmem:[%s2380_s19 + $0x30] sm:$0xff] }
 0x423   : > { %1749 = vtanh.f32 %v1339_v26  ;;  %v1338_v14 = vadd.f32 %v2357_v58, %v1316_v48  ;;  %v1319_v0 = vmul.f32 %v2351_v22, %v1297_v9  ;;  %v1296_v33 = vmul.f32 %v1728_v37, %v2291_v62 }
 0x424   : > { %v1730_v46 = vpop.eup %1729  ;;  %1751 = vrsqrt.f32 %v1273_v38  ;;  %v1272_v40 = vadd.f32 1e-05, %v1256_v42  ;;  %v1375_v38 = vld [vmem:[%s2380_s19 + $0x48] sm:$0xff] }
 0x425   : > { %1753 = vtanh.f32 %v1338_v14  ;;  %v1341_v47 = vadd.f32 %v2357_v58, %v1319_v0  ;;  %v1318_v51 = vmul.f32 %v2351_v22, %v1296_v33  ;;  %v1299_v53 = vmul.f32 %v1730_v46, %v2297_v35  ;;  %v1366_v35 = vld [vmem:[%s2380_s19] sm:$0xff] }
 0x426   : > { %v1732_v12 = vpop.eup %1731  ;;  %1755 = vrsqrt.f32 %v1272_v40 }
 0x427   : > { %1757 = vtanh.f32 %v1341_v47  ;;  %v1340_v36 = vadd.f32 %v2357_v58, %v1318_v51  ;;  %v1321_v62 = vmul.f32 %v2351_v22, %v1299_v53  ;;  %v1298_v55 = vmul.f32 %v1732_v12, %v2303_v29  ;;  %v1377_v51 = vld [vmem:[%s2380_s19 + $0x58] sm:$0xff]  ;;  %v1376_v12 = vld [vmem:[%s2380_s19 + $0x50] sm:$0xff] }
 0x428   : > { %v1734_v59 = vpop.eup %1733 }
 0x429   : > { %v1736_v39 = vpop.eup %1735  ;;  %v1383_v50 = vadd.f32 %v1734_v59, %v1367_v21  ;;  %1759 = vtanh.f32 %v1340_v36  ;;  %v1343_v23 = vadd.f32 %v2357_v58, %v1321_v62  ;;  %v1320_v1 = vmul.f32 %v2351_v22, %v1298_v55  ;;  %v1379_v36 = vld [vmem:[%s2380_s19 + $0x68] sm:$0xff]  ;;  %v1378_v59 = vld [vmem:[%s2380_s19 + $0x60] sm:$0xff] }
 0x42a   : > { %v1738_v43 = vpop.eup %1737  ;;  %v1301_v29 = vmul.f32 %v1736_v39, %v2309_v45 }
 0x42b   : > { %v1740_v57 = vpop.eup %1739  ;;  %1399 = vst.msk [vmem:[%s2396_s22 + $0x8] sm:$0xff] %vm1096_vm2, %v1383_v50  ;;  %v1382_v5 = vadd.f32 %v1738_v43, %v1366_v35  ;;  %1761 = vtanh.f32 %v1343_v23  ;;  %v1342_v6 = vadd.f32 %v2357_v58, %v1320_v1  ;;  %v1381_v50 = vld [vmem:[%s2380_s19 + $0x78] sm:$0xff]  ;;  %v1380_v43 = vld [vmem:[%s2380_s19 + $0x70] sm:$0xff] }
 0x42c   : > { %v1742_v7 = vpop.eup %1741  ;;  %v1323_v18 = vmul.f32 %v2351_v22, %v1301_v29  ;;  %v1300_v49 = vmul.f32 %v1740_v57, %v2315_v52 }
 0x42d   : > { %v1744_v31 = vpop.eup %1743  ;;  %1398 = vst.msk [vmem:[%s2396_s22] sm:$0xff] %vm1096_vm2, %v1382_v5  ;;  %v1385_v61 = vadd.f32 %v1742_v7, %v1369_v30  ;;  %1763 = vtanh.f32 %v1342_v6 }
 0x42e   : > { %v1746_v45 = vpop.eup %1745  ;;  %v1345_v56 = vadd.f32 %v2357_v58, %v1323_v18  ;;  %v1322_v13 = vmul.f32 %v2351_v22, %v1300_v49  ;;  %v1303_v44 = vmul.f32 %v1744_v31, %v2321_v60 }
 0x42f   : > { %v1748_v16 = vpop.eup %1747  ;;  %1401 = vst.msk [vmem:[%s2396_s22 + $0x18] sm:$0xff] %vm1096_vm2, %v1385_v61  ;;  %v1384_v2 = vadd.f32 %v1746_v45, %v1368_v10 }
 0x430   : > { %v1750_v52 = vpop.eup %1749  ;;  %1765 = vtanh.f32 %v1345_v56  ;;  %v1344_v20 = vadd.f32 %v2357_v58, %v1322_v13  ;;  %v1325_v19 = vmul.f32 %v2351_v22, %v1303_v44  ;;  %v1302_v24 = vmul.f32 %v1748_v16, %v2327_v63 }
 0x431   : > { %v1752_v25 = vpop.eup %1751  ;;  %1400 = vst.msk [vmem:[%s2396_s22 + $0x10] sm:$0xff] %vm1096_vm2, %v1384_v2  ;;  %v1387_v27 = vadd.f32 %v1750_v52, %v1371_v11 }
 0x432   : > { %v1754_v60 = vpop.eup %1753  ;;  %1767 = vtanh.f32 %v1344_v20  ;;  %v1347_v28 = vadd.f32 %v2357_v58, %v1325_v19  ;;  %v1324_v4 = vmul.f32 %v2351_v22, %v1302_v24  ;;  %v1305_v8 = vmul.f32 %v1752_v25, %v2333_v3 }
 0x433   : > { %v1756_v34 = vpop.eup %1755  ;;  %1403 = vst.msk [vmem:[%s2396_s22 + $0x28] sm:$0xff] %vm1096_vm2, %v1387_v27  ;;  %v1386_v63 = vadd.f32 %v1754_v60, %v1370_v17 }
 0x434   : > { %v1758_v41 = vpop.eup %1757  ;;  %1769 = vtanh.f32 %v1347_v28  ;;  %v1346_v26 = vadd.f32 %v2357_v58, %v1324_v4  ;;  %v1327_v48 = vmul.f32 %v2351_v22, %v1305_v8  ;;  %v1304_v9 = vmul.f32 %v1756_v34, %v2339_v54  ;;  %v1374_v54 = vld [vmem:[%s2380_s19 + $0x40] sm:$0xff] }
 0x435   : > { %1402 = vst.msk [vmem:[%s2396_s22 + $0x20] sm:$0xff] %vm1096_vm2, %v1386_v63  ;;  %v1389_v37 = vadd.f32 %v1758_v41, %v1373_v32 }
 0x436   : > { %v1760_v3 = vpop.eup %1759  ;;  %1771 = vtanh.f32 %v1346_v26  ;;  %v1349_v42 = vadd.f32 %v2357_v58, %v1327_v48  ;;  %v1326_v14 = vmul.f32 %v2351_v22, %v1304_v9 }
 0x437   : > { %1405 = vst.msk [vmem:[%s2396_s22 + $0x38] sm:$0xff] %vm1096_vm2, %v1389_v37  ;;  %v1388_v0 = vadd.f32 %v1760_v3, %v1372_v15 }
 0x438   : > { %v1762_v33 = vpop.eup %1761  ;;  %1773 = vtanh.f32 %v1349_v42  ;;  %v1348_v46 = vadd.f32 %v2357_v58, %v1326_v14 }
 0x439   : > { %1404 = vst.msk [vmem:[%s2396_s22 + $0x30] sm:$0xff] %vm1096_vm2, %v1388_v0  ;;  %v1391_v40 = vadd.f32 %v1762_v33, %v1375_v38 }
 0x43a   : > { %v1764_v47 = vpop.eup %1763  ;;  %1775 = vtanh.f32 %v1348_v46 }
 0x43b   : > { %1407 = vst.msk [vmem:[%s2396_s22 + $0x48] sm:$0xff] %vm1096_vm2, %v1391_v40  ;;  %v1390_v22 = vadd.f32 %v1764_v47, %v1374_v54 }
 0x43d   : > { %v1766_v53 = vpop.eup %1765  ;;  %1406 = vst.msk [vmem:[%s2396_s22 + $0x40] sm:$0xff] %vm1096_vm2, %v1390_v22 }
 0x43e   : > { %v1393_v58 = vadd.f32 %v1766_v53, %v1377_v51 }
 0x43f   : > { %v1768_v21 = vpop.eup %1767 }
 0x440   : > { %1409 = vst.msk [vmem:[%s2396_s22 + $0x58] sm:$0xff] %vm1096_vm2, %v1393_v58  ;;  %v1392_v62 = vadd.f32 %v1768_v21, %v1376_v12 }
 0x441   : > { %v1770_v55 = vpop.eup %1769 }
 0x442   : > { %1408 = vst.msk [vmem:[%s2396_s22 + $0x50] sm:$0xff] %vm1096_vm2, %v1392_v62  ;;  %v1395_v35 = vadd.f32 %v1770_v55, %v1379_v36 }
 0x443   : > { %v1772_v39 = vpop.eup %1771 }
 0x444   : > { %1411 = vst.msk [vmem:[%s2396_s22 + $0x68] sm:$0xff] %vm1096_vm2, %v1395_v35  ;;  %v1394_v23 = vadd.f32 %v1772_v39, %v1378_v59 }
 0x445   : > { %v1774_v1 = vpop.eup %1773 }
 0x446   : > { %1410 = vst.msk [vmem:[%s2396_s22 + $0x60] sm:$0xff] %vm1096_vm2, %v1394_v23  ;;  %v1397_v30 = vadd.f32 %v1774_v1, %v1381_v50 }
 0x447   : > { %v1776_v29 = vpop.eup %1775 }
 0x448   : > { %1413 = vst.msk [vmem:[%s2396_s22 + $0x78] sm:$0xff] %vm1096_vm2, %v1397_v30  ;;  %v1396_v57 = vadd.f32 %v1776_v29, %v1380_v43 }
 0x44a   : > { %1412 = vst.msk [vmem:[%s2396_s22 + $0x70] sm:$0xff] %vm1096_vm2, %v1396_v57 }
 0x44b PF: > { %s20_s13 = sadd.s32 1, %s1783_s13  }
 0x44c   : > { %p17_p4 = scmp.ge.s32.totalorder %s20_s13, 5  }
 0x44e   :  { %19 = sbr.rel (!%p17_p4) target bundleno = 1 (0x1), region = 93 }

</bundles_post_ra>
